<compile_context>
chip_gen: v7x
topology: tpu7x:2x2x1
jax: 0.10.0
libtpu: 0.0.40
codegen_flags: <defaults>
</compile_context>

<pallas_src>
import functools

import jax
import jax.numpy as jnp
from jax import lax
from jax.experimental import pallas as pl
from jax.experimental.pallas import tpu as pltpu


def _query_vmem_capacity():
    """Physical VMEM bytes for this generation (fallback: conservative 64 MiB)."""
    try:
        info = pltpu.get_tpu_info()
        for attr in ("vmem_capacity_bytes", "vmem_size_bytes", "vmem_bytes"):
            v = getattr(info, attr, None)
            if v:
                return int(v)
    except Exception:
        pass
    return 64 * 1024 * 1024


# ~3/4 of physical VMEM: ~96 MiB on v5e/v6e (128 MiB), ~48 MiB on v7x (64 MiB).
_VMEM_LIMIT = min((_query_vmem_capacity() * 3) // 4, 100 * 1024 * 1024)


def _tile(dim, target, align):
    """Largest tile <= target that divides dim and is a multiple of `align`,
    else the full dim (full-dim blocks are always legal)."""
    if dim <= target:
        return dim
    t = (target // align) * align
    while t >= align:
        if dim % t == 0:
            return t
        t -= align
    return dim


# ----------------------------- tiled linear -----------------------------

def _linear_kernel(x_ref, w_ref, b_ref, o_ref, acc_ref, *, activation):
    @pl.when(pl.program_id(2) == 0)
    def _():
        acc_ref[...] = jnp.zeros(acc_ref.shape, acc_ref.dtype)

    acc_ref[...] += jnp.dot(x_ref[...].astype(jnp.bfloat16),
                            w_ref[...].astype(jnp.bfloat16),
                            preferred_element_type=jnp.float32)

    @pl.when(pl.program_id(2) == pl.num_programs(2) - 1)
    def _():
        y = acc_ref[...] + b_ref[...]
        if activation == "relu":
            y = jnp.maximum(y, 0.0)
        o_ref[...] = y.astype(o_ref.dtype)


def linear(x, w, b, activation=None, out_dtype=jnp.bfloat16,
           tm=512, tn=512, tk=512):
    """x: (M, K) @ w: (K, N) + b: (N,) -> (M, N); bf16 MXU, f32 accumulate."""
    M, K = x.shape
    N = w.shape[1]
    tm = _tile(M, tm, 16)
    tn = _tile(N, tn, 128)
    tk = _tile(K, tk, 128)
    # TODO(synk): on v5e, pipeline_mode=pl.Buffered(3) on the weight spec if the
    #             K-loop weight stream shows exposed DMA.
    return pl.pallas_call(
        functools.partial(_linear_kernel, activation=activation),
        out_shape=jax.ShapeDtypeStruct((M, N), out_dtype),
        grid=(M // tm, N // tn, K // tk),
        in_specs=[
            pl.BlockSpec((tm, tk), lambda i, j, k: (i, k)),
            pl.BlockSpec((tk, tn), lambda i, j, k: (k, j)),
            pl.BlockSpec((1, tn), lambda i, j, k: (0, j)),
        ],
        out_specs=pl.BlockSpec((tm, tn), lambda i, j, k: (i, j)),
        scratch_shapes=[pltpu.VMEM((tm, tn), jnp.float32)],
        compiler_params=pltpu.CompilerParams(
            dimension_semantics=("parallel", "parallel", "arbitrary"),
            vmem_limit_bytes=_VMEM_LIMIT),
    )(x, w, b.reshape(1, N))


# --------------- linear + residual-add + LayerNorm (fused epilogue) ---------------

def _linear_res_ln_kernel(x_ref, w_ref, b_ref, r_ref, g_ref, bt_ref, o_ref,
                          acc_ref, *, eps):
    @pl.when(pl.program_id(1) == 0)
    def _():
        acc_ref[...] = jnp.zeros(acc_ref.shape, acc_ref.dtype)

    acc_ref[...] += jnp.dot(x_ref[...].astype(jnp.bfloat16),
                            w_ref[...].astype(jnp.bfloat16),
                            preferred_element_type=jnp.float32)

    @pl.when(pl.program_id(1) == pl.num_programs(1) - 1)
    def _():
        y = acc_ref[...] + b_ref[...] + r_ref[...].astype(jnp.float32)
        mu = jnp.mean(y, axis=-1, keepdims=True)
        var = jnp.mean(jnp.square(y - mu), axis=-1, keepdims=True)
        yn = (y - mu) * lax.rsqrt(var + eps)
        o_ref[...] = (yn * g_ref[...] + bt_ref[...]).astype(o_ref.dtype)


def linear_res_ln(x, w, b, res, g, beta, eps=1e-5, tm=256, tk=512):
    """LayerNorm(res + x @ w + b) fused; output width = full N (needed for LN)."""
    M, K = x.shape
    N = w.shape[1]
    tm = _tile(M, tm, 16)
    tk = _tile(K, tk, 128)
    return pl.pallas_call(
        functools.partial(_linear_res_ln_kernel, eps=eps),
        out_shape=jax.ShapeDtypeStruct((M, N), jnp.bfloat16),
        grid=(M // tm, K // tk),
        in_specs=[
            pl.BlockSpec((tm, tk), lambda i, k: (i, k)),
            pl.BlockSpec((tk, N), lambda i, k: (k, 0)),
            pl.BlockSpec((1, N), lambda i, k: (0, 0)),
            pl.BlockSpec((tm, N), lambda i, k: (i, 0)),   # residual (fetched once per i)
            pl.BlockSpec((1, N), lambda i, k: (0, 0)),
            pl.BlockSpec((1, N), lambda i, k: (0, 0)),
        ],
        out_specs=pl.BlockSpec((tm, N), lambda i, k: (i, 0)),
        scratch_shapes=[pltpu.VMEM((tm, N), jnp.float32)],
        compiler_params=pltpu.CompilerParams(
            dimension_semantics=("parallel", "arbitrary"),
            vmem_limit_bytes=_VMEM_LIMIT),
    )(x, w, b.reshape(1, N), res, g.reshape(1, N), beta.reshape(1, N))


# ---------------------- fused FFN + residual + LayerNorm ----------------------

def _ffn_res_ln_kernel(x_ref, w1_ref, b1_ref, w2_ref, b2_ref, g_ref, bt_ref,
                       o_ref, *, eps):
    x = x_ref[...]
    h = jnp.dot(x.astype(jnp.bfloat16), w1_ref[...],
                preferred_element_type=jnp.float32)
    h = jnp.maximum(h + b1_ref[...], 0.0)
    y = jnp.dot(h.astype(jnp.bfloat16), w2_ref[...],
                preferred_element_type=jnp.float32) + b2_ref[...]
    y = y + x.astype(jnp.float32)                       # residual = FFN input
    mu = jnp.mean(y, axis=-1, keepdims=True)
    var = jnp.mean(jnp.square(y - mu), axis=-1, keepdims=True)
    yn = (y - mu) * lax.rsqrt(var + eps)
    o_ref[...] = (yn * g_ref[...] + bt_ref[...]).astype(o_ref.dtype)


def ffn_res_ln(x, w1, b1, w2, b2, g, beta, eps=1e-5, tm=256):
    """LayerNorm(x + Linear(ReLU(Linear(x)))) — hidden stays in VMEM when it fits."""
    M, E = x.shape
    F = w1.shape[1]
    tm = _tile(M, tm, 16)
    w_bytes = 2 * 2 * E * F * w1.dtype.itemsize            # double-buffered w1+w2
    act_bytes = 2 * 2 * tm * E * 4 + tm * F * 4             # x/out (dbl-buf) + hidden
    if w_bytes + act_bytes > _VMEM_LIMIT // 2:
        # TODO(synk): on v7x, pipeline_mode=pl.Buffered(1) on the constant-index
        #             weight specs would keep the fused path viable for larger E*F.
        h = linear(x, w1, b1, activation="relu")
        return linear_res_ln(h, w2, b2, x, g, beta, eps=eps)
    return pl.pallas_call(
        functools.partial(_ffn_res_ln_kernel, eps=eps),
        out_shape=jax.ShapeDtypeStruct((M, E), jnp.bfloat16),
        grid=(M // tm,),
        in_specs=[
            pl.BlockSpec((tm, E), lambda i: (i, 0)),
            pl.BlockSpec((E, F), lambda i: (0, 0)),
            pl.BlockSpec((1, F), lambda i: (0, 0)),
            pl.BlockSpec((F, E), lambda i: (0, 0)),
            pl.BlockSpec((1, E), lambda i: (0, 0)),
            pl.BlockSpec((1, E), lambda i: (0, 0)),
            pl.BlockSpec((1, E), lambda i: (0, 0)),
        ],
        out_specs=pl.BlockSpec((tm, E), lambda i: (i, 0)),
        compiler_params=pltpu.CompilerParams(
            dimension_semantics=("parallel",),
            vmem_limit_bytes=_VMEM_LIMIT),
    )(x, w1, b1.reshape(1, F), w2, b2.reshape(1, E),
      g.reshape(1, E), beta.reshape(1, E))


# --------------- multi-head flash attention (lane-dense, no transposes) ---------------

def _mha_flash_kernel(q_ref, k_ref, v_ref, o_ref, m_sc, l_sc, acc_sc,
                      *, scale, num_heads):
    # NOTE: m/l/acc scratch carries online-softmax state across the kv axis,
    # which therefore MUST remain the innermost ("arbitrary") grid dimension.
    kv = pl.program_id(2)

    @pl.when(kv == 0)
    def _():
        m_sc[...] = jnp.full(m_sc.shape, -jnp.inf, m_sc.dtype)
        l_sc[...] = jnp.zeros(l_sc.shape, l_sc.dtype)
        acc_sc[...] = jnp.zeros(acc_sc.shape, acc_sc.dtype)

    q = q_ref[0]                                   # (tq, E) bf16
    k = k_ref[0]                                   # (tk, E) bf16
    v = v_ref[0]                                   # (tk, E) bf16
    E = q.shape[-1]
    dh = E // num_heads

    m_prev = m_sc[...]                             # (tq, H)
    l_prev = l_sc[...]                             # (tq, H)
    acc_prev = acc_sc[...]                         # (tq, E)

    m_cols, l_cols, acc_cols = [], [], []
    for h in range(num_heads):
        sl = slice(h * dh, (h + 1) * dh)
        qh = q[:, sl] * scale                      # fold 1/sqrt(dh) into q (bf16)
        s = lax.dot_general(qh, k[:, sl], (((1,), (1,)), ((), ())),
                            preferred_element_type=jnp.float32)    # (tq, tk)
        m_p = m_prev[:, h:h + 1]
        m_n = jnp.maximum(m_p, jnp.max(s, axis=-1, keepdims=True))
        alpha = jnp.exp(m_p - m_n)
        p = jnp.exp(s - m_n)
        l_n = alpha * l_prev[:, h:h + 1] + jnp.sum(p, axis=-1, keepdims=True)
        pv = jnp.dot(p.astype(jnp.bfloat16), v[:, sl],
                     preferred_element_type=jnp.float32)           # (tq, dh)
        acc_cols.append(alpha * acc_prev[:, sl] + pv)
        m_cols.append(m_n)
        l_cols.append(l_n)

    m_sc[...] = jnp.concatenate(m_cols, axis=1)
    l_sc[...] = jnp.concatenate(l_cols, axis=1)
    acc_sc[...] = jnp.concatenate(acc_cols, axis=1)

    @pl.when(kv == pl.num_programs(2) - 1)
    def _():
        l = l_sc[...]
        acc = acc_sc[...]
        cols = [acc[:, h * dh:(h + 1) * dh] *
                pl.reciprocal(l[:, h:h + 1], approx=True)
                for h in range(num_heads)]
        # single lane-dense (tq, E) store — no masked narrow per-head writes
        o_ref[0] = jnp.concatenate(cols, axis=1).astype(o_ref.dtype)


def mha_flash(q, k, v, num_heads, tq=128, tk=None):
    """q, k, v: (B, S, E) with heads packed along E -> (B, S, E) attention output."""
    B, S, E = q.shape
    dh = E // num_heads
    scale = 1.0 / float(dh) ** 0.5
    tq = _tile(S, tq, 16)
    if tk is None:
        kv_bytes = 2 * 2 * S * E * q.dtype.itemsize     # K + V, double-buffered
        # constant kv block index across q tiles => K/V fetched once per batch
        tk = S if kv_bytes <= 8 * 1024 * 1024 else 128
    tk = _tile(S, tk, 16)
    q_spec = pl.BlockSpec((1, tq, E), lambda b, qi, ki: (b, qi, 0))
    kv_spec = pl.BlockSpec((1, tk, E), lambda b, qi, ki: (b, ki, 0))
    return pl.pallas_call(
        functools.partial(_mha_flash_kernel, scale=scale, num_heads=num_heads),
        out_shape=jax.ShapeDtypeStruct((B, S, E), jnp.bfloat16),
        grid=(B, S // tq, S // tk),
        in_specs=[q_spec, kv_spec, kv_spec],
        out_specs=q_spec,
        scratch_shapes=[
            pltpu.VMEM((tq, num_heads), jnp.float32),   # running max (per head)
            pltpu.VMEM((tq, num_heads), jnp.float32),   # running denom (per head)
            pltpu.VMEM((tq, E), jnp.float32),           # running output acc
        ],
        compiler_params=pltpu.CompilerParams(
            dimension_semantics=("parallel", "parallel", "arbitrary"),
            vmem_limit_bytes=_VMEM_LIMIT),
    )(q, k, v)


# ---------------------- mean over sequence + classifier ----------------------

def _mean_classifier_kernel(x_ref, w_ref, b_ref, o_ref, acc_ref, *, inv_s):
    @pl.when(pl.program_id(0) == 0)
    def _():
        acc_ref[...] = jnp.zeros(acc_ref.shape, acc_ref.dtype)

    acc_ref[...] += jnp.sum(x_ref[...].astype(jnp.float32), axis=1)

    @pl.when(pl.program_id(0) == pl.num_programs(0) - 1)
    def _():
        m = acc_ref[...] * inv_s
        y = jnp.dot(m, w_ref[...], preferred_element_type=jnp.float32) + b_ref[...]
        o_ref[...] = y.astype(o_ref.dtype)


def mean_classifier(x_bse, w, b, ts=512):
    # TODO(synk): add a parallel B/E grid axis so both v7x TensorCores are used.
    B, S, E = x_bse.shape
    C = w.shape[1]
    ts = _tile(S, ts, 8)
    return pl.pallas_call(
        functools.partial(_mean_classifier_kernel, inv_s=1.0 / S),
        out_shape=jax.ShapeDtypeStruct((B, C), jnp.float32),
        grid=(S // ts,),
        in_specs=[
            pl.BlockSpec((B, ts, E), lambda s: (0, s, 0)),
            pl.BlockSpec((E, C), lambda s: (0, 0)),
            pl.BlockSpec((1, C), lambda s: (0, 0)),
        ],
        out_specs=pl.BlockSpec((B, C), lambda s: (0, 0)),
        scratch_shapes=[pltpu.VMEM((B, E), jnp.float32)],
        compiler_params=pltpu.CompilerParams(
            dimension_semantics=("arbitrary",),
            vmem_limit_bytes=_VMEM_LIMIT),
    )(x_bse, w, b.reshape(1, C))


# ----------------------------- parameters -----------------------------

def init_params(key, *, seq_length, in_channels, embed_dim, num_heads,
                num_layers, patch_size, img_size, num_classes,
                dim_feedforward=2048):
    """Deterministic synthetic parameters (shapes follow the PyTorch module).
    Matmul weights stored bf16 (halves HBM weight streaming); biases/LN f32."""
    def normal(k, shape, scale=0.02, dtype=jnp.bfloat16):
        return (scale * jax.random.normal(k, shape)).astype(dtype)

    n_patches = (img_size // patch_size) ** 2
    S = seq_length * n_patches
    kdim = in_channels * patch_size * patch_size
    keys = jax.random.split(key, 4 + num_layers)

    params = {
        "patch_size": patch_size,
        "num_heads": num_heads,
        "embed_dim": embed_dim,
        "w_patch": normal(keys[0], (kdim, embed_dim)),
        "b_patch": jnp.zeros((embed_dim,), jnp.float32),
        "pos": normal(keys[1], (1, S, embed_dim)),
        "cls_w": normal(keys[2], (embed_dim, num_classes), dtype=jnp.float32),
        "cls_b": jnp.zeros((num_classes,), jnp.float32),
        "layers": [],
    }
    for li in range(num_layers):
        lkeys = jax.random.split(keys[4 + li], 6)
        params["layers"].append({
            # packed in_proj split into per-tensor projections (same math,
            # avoids the fused-qkv slicing / head transposes downstream)
            "wq": normal(lkeys[0], (embed_dim, embed_dim)),
            "wk": normal(lkeys[1], (embed_dim, embed_dim)),
            "wv": normal(lkeys[2], (embed_dim, embed_dim)),
            "bq": jnp.zeros((embed_dim,), jnp.float32),
            "bk": jnp.zeros((embed_dim,), jnp.float32),
            "bv": jnp.zeros((embed_dim,), jnp.float32),
            "out_proj_w": normal(lkeys[3], (embed_dim, embed_dim)),
            "out_proj_b": jnp.zeros((embed_dim,), jnp.float32),
            "ln1_g": jnp.ones((embed_dim,), jnp.float32),
            "ln1_b": jnp.zeros((embed_dim,), jnp.float32),
            "ln2_g": jnp.ones((embed_dim,), jnp.float32),
            "ln2_b": jnp.zeros((embed_dim,), jnp.float32),
            "ffn1_w": normal(lkeys[4], (embed_dim, dim_feedforward)),
            "ffn1_b": jnp.zeros((dim_feedforward,), jnp.float32),
            "ffn2_w": normal(lkeys[5], (dim_feedforward, embed_dim)),
            "ffn2_b": jnp.zeros((embed_dim,), jnp.float32),
        })
    return params


# ----------------------------- forward pass -----------------------------

def fire_transformer_forward(params, x):
    """x: (B, T, C, H, W) float32 -> logits (B, num_classes)."""
    B, T, C, H, W = x.shape
    P = params["patch_size"]
    E = params["embed_dim"]
    Hh = params["num_heads"]
    Hp, Wp = H // P, W // P
    S = T * Hp * Wp

    # --- temporal patch embedding (per-frame Conv2d == patch-flatten matmul) ---
    patches = x.reshape(B, T, C, Hp, P, Wp, P)
    patches = patches.transpose(0, 1, 3, 5, 2, 4, 6).reshape(B * S, C * P * P)
    tok = linear(patches, params["w_patch"], params["b_patch"])      # (B*S, E) bf16
    xs = tok.reshape(B, S, E) + params["pos"]                        # (B, S, E) bf16
    # PyTorch's transpose(0,1) to (S,B,E) is pure layout; batch-first is identical.

    # --- transformer encoder layers (post-LN, ReLU FFN, dropout=identity/eval) ---
    for layer in params["layers"]:
        x2 = xs.reshape(B * S, E)
        # Separate Q/K/V projections: no fused-qkv slicing, no head transposes.
        q = linear(x2, layer["wq"], layer["bq"]).reshape(B, S, E)
        k = linear(x2, layer["wk"], layer["bk"]).reshape(B, S, E)
        v = linear(x2, layer["wv"], layer["bv"]).reshape(B, S, E)

        attn = mha_flash(q, k, v, Hh).reshape(B * S, E)              # lane-dense

        # out_proj + residual-add + LayerNorm fused into one matmul epilogue
        y = linear_res_ln(attn, layer["out_proj_w"], layer["out_proj_b"],
                          x2, layer["ln1_g"], layer["ln1_b"])
        # FFN (Linear+ReLU+Linear) + residual + LayerNorm fused, hidden in VMEM
        x2 = ffn_res_ln(y, layer["ffn1_w"], layer["ffn1_b"],
                        layer["ffn2_w"], layer["ffn2_b"],
                        layer["ln2_g"], layer["ln2_b"])
        xs = x2.reshape(B, S, E)

    # --- mean over sequence dim + classifier (tiled, fused Pallas kernel) ---
    return mean_classifier(xs, params["cls_w"], params["cls_b"])


# ----------------------------- main -----------------------------

if __name__ == "__main__":
    # Small, self-consistent config.
    B, T, C = 2, 2, 4
    IMG, PATCH = 8, 4
    EMBED, HEADS, LAYERS, CLASSES = 32, 4, 2, 3

    key = jax.random.PRNGKey(0)
    pkey, xkey = jax.random.split(key)

    params = init_params(
        pkey,
        seq_length=T, in_channels=C, embed_dim=EMBED, num_heads=HEADS,
        num_layers=LAYERS, patch_size=PATCH, img_size=IMG, num_classes=CLASSES,
    )

    x = jax.random.normal(xkey, (B, T, C, IMG, IMG), dtype=jnp.float32)

    fwd = jax.jit(lambda inp: fire_transformer_forward(params, inp))
    logits = fwd(x)
    jax.block_until_ready(logits)
    assert logits.shape == (B, CLASSES), logits.shape
    assert bool(jnp.all(jnp.isfinite(logits)))
    print("KERNEL_OK")
</pallas_src>

<mosaic_0001>
module attributes {stable_mosaic.version = 11 : i64} {
  func.func @_linear_kernel(%arg0: i32, %arg1: i32, %arg2: i32, %arg3: memref<16x64xf32, #tpu.memory_space<vmem>>, %arg4: memref<64x32xbf16, #tpu.memory_space<vmem>>, %arg5: memref<1x32xf32, #tpu.memory_space<vmem>>, %arg6: memref<16x32xbf16, #tpu.memory_space<vmem>>, %arg7: memref<16x32xf32, #tpu.memory_space<vmem>>) attributes {dimension_semantics = [#tpu.dimension_semantics<parallel>, #tpu.dimension_semantics<parallel>, #tpu.dimension_semantics<arbitrary>], iteration_bounds = array<i64: 1, 1, 1>, scalar_prefetch = 0 : i64, scratch_operands = 1 : i64, tpu.core_type = #tpu.core_type<tc>, window_params = [{transform_indices = @transform_0, window_bounds = array<i64: 16, 64>}, {transform_indices = @transform_1, window_bounds = array<i64: 64, 32>}, {transform_indices = @transform_2, window_bounds = array<i64: 1, 32>}, {transform_indices = @transform_3, window_bounds = array<i64: 16, 32>}]} {
    %c0_i32 = arith.constant 0 : i32
    %0 = arith.cmpi eq, %arg2, %c0_i32 : i32
    %1 = arith.extui %0 : i1 to i32
    %c0_i32_0 = arith.constant 0 : i32
    %2 = arith.cmpi ne, %1, %c0_i32_0 : i32
    scf.if %2 {
      %cst_10 = arith.constant 0.000000e+00 : f32
      %13 = vector.broadcast %cst_10 : f32 to vector<16x32xf32>
      %c0_11 = arith.constant 0 : index
      %c0_12 = arith.constant 0 : index
      %14 = vector.load %arg7[%c0_11, %c0_12] : memref<16x32xf32, #tpu.memory_space<vmem>>, vector<16x32xf32>
      tpu.vector_store %arg7[%c0_11, %c0_12], %13 {strides = array<i32>} : memref<16x32xf32, #tpu.memory_space<vmem>>, vector<16x32xf32>,
    } else {
    }
    %c0 = arith.constant 0 : index
    %c0_1 = arith.constant 0 : index
    %3 = vector.load %arg7[%c0, %c0_1] : memref<16x32xf32, #tpu.memory_space<vmem>>, vector<16x32xf32>
    %c0_2 = arith.constant 0 : index
    %c0_3 = arith.constant 0 : index
    %4 = vector.load %arg3[%c0_2, %c0_3] : memref<16x64xf32, #tpu.memory_space<vmem>>, vector<16x64xf32>
    %5 = arith.truncf %4 : vector<16x64xf32> to vector<16x64xbf16>
    %c0_4 = arith.constant 0 : index
    %c0_5 = arith.constant 0 : index
    %6 = vector.load %arg4[%c0_4, %c0_5] : memref<64x32xbf16, #tpu.memory_space<vmem>>, vector<64x32xbf16>
    %cst = arith.constant dense<0.000000e+00> : vector<16x32xf32>
    %7 = tpu.matmul %5, %6, %cst {dimension_numbers = #tpu.dot_dimension_numbers<[1], [0], [0], [1], [0, 0, 1, 1], [], []>} : vector<16x64xbf16>, vector<64x32xbf16>, vector<16x32xf32> -> vector<16x32xf32>
    %8 = arith.addf %3, %7 : vector<16x32xf32>
    %c0_6 = arith.constant 0 : index
    %c0_7 = arith.constant 0 : index
    %9 = vector.load %arg7[%c0_6, %c0_7] : memref<16x32xf32, #tpu.memory_space<vmem>>, vector<16x32xf32>
    tpu.vector_store %arg7[%c0_6, %c0_7], %8 {strides = array<i32>} : memref<16x32xf32, #tpu.memory_space<vmem>>, vector<16x32xf32>,
    %c0_i32_8 = arith.constant 0 : i32
    %10 = arith.cmpi eq, %arg2, %c0_i32_8 : i32
    %11 = arith.extui %10 : i1 to i32
    %c0_i32_9 = arith.constant 0 : i32
    %12 = arith.cmpi ne, %11, %c0_i32_9 : i32
    scf.if %12 {
      %c0_10 = arith.constant 0 : index
      %c0_11 = arith.constant 0 : index
      %13 = vector.load %arg7[%c0_10, %c0_11] : memref<16x32xf32, #tpu.memory_space<vmem>>, vector<16x32xf32>
      %c0_12 = arith.constant 0 : index
      %c0_13 = arith.constant 0 : index
      %14 = vector.load %arg5[%c0_12, %c0_13] : memref<1x32xf32, #tpu.memory_space<vmem>>, vector<1x32xf32>
      %15 = vector.broadcast %14 : vector<1x32xf32> to vector<16x32xf32>
      %16 = arith.addf %13, %15 : vector<16x32xf32>
      %17 = arith.truncf %16 : vector<16x32xf32> to vector<16x32xbf16>
      %c0_14 = arith.constant 0 : index
      %c0_15 = arith.constant 0 : index
      %18 = vector.load %arg6[%c0_14, %c0_15] : memref<16x32xbf16, #tpu.memory_space<vmem>>, vector<16x32xbf16>
      tpu.vector_store %arg6[%c0_14, %c0_15], %17 {strides = array<i32>} : memref<16x32xbf16, #tpu.memory_space<vmem>>, vector<16x32xbf16>,
    } else {
    }
    return
  }
  func.func @transform_0(%arg0: i32, %arg1: i32, %arg2: i32) -> (i32, i32) {
    %c0_i32 = arith.constant 0 : i32
    return %arg0, %arg2 : i32, i32
  }
  func.func @transform_1(%arg0: i32, %arg1: i32, %arg2: i32) -> (i32, i32) {
    %c0_i32 = arith.constant 0 : i32
    return %arg2, %arg1 : i32, i32
  }
  func.func @transform_2(%arg0: i32, %arg1: i32, %arg2: i32) -> (i32, i32) {
    %c0_i32 = arith.constant 0 : i32
    %c0_i32_0 = arith.constant 0 : i32
    return %c0_i32, %arg1 : i32, i32
  }
  func.func @transform_3(%arg0: i32, %arg1: i32, %arg2: i32) -> (i32, i32) {
    %c0_i32 = arith.constant 0 : i32
    return %arg0, %arg1 : i32, i32
  }
}

module attributes {stable_mosaic.version = 11 : i64} {
  func.func @_mha_flash_kernel(%arg0: i32, %arg1: i32, %arg2: i32, %arg3: memref<1x8x32xbf16, #tpu.memory_space<vmem>>, %arg4: memref<1x8x32xbf16, #tpu.memory_space<vmem>>, %arg5: memref<1x8x32xbf16, #tpu.memory_space<vmem>>, %arg6: memref<1x8x32xbf16, #tpu.memory_space<vmem>>, %arg7: memref<8x4xf32, #tpu.memory_space<vmem>>, %arg8: memref<8x4xf32, #tpu.memory_space<vmem>>, %arg9: memref<8x32xf32, #tpu.memory_space<vmem>>) attributes {dimension_semantics = [#tpu.dimension_semantics<parallel>, #tpu.dimension_semantics<parallel>, #tpu.dimension_semantics<arbitrary>], iteration_bounds = array<i64: 2, 1, 1>, scalar_prefetch = 0 : i64, scratch_operands = 3 : i64, tpu.core_type = #tpu.core_type<tc>, window_params = [{transform_indices = @transform_0, window_bounds = array<i64: 1, 8, 32>}, {transform_indices = @transform_1, window_bounds = array<i64: 1, 8, 32>}, {transform_indices = @transform_2, window_bounds = array<i64: 1, 8, 32>}, {transform_indices = @transform_3, window_bounds = array<i64: 1, 8, 32>}]} {
    %c0_i32 = arith.constant 0 : i32
    %0 = arith.cmpi eq, %arg2, %c0_i32 : i32
    %1 = arith.extui %0 : i1 to i32
    %c0_i32_0 = arith.constant 0 : i32
    %2 = arith.cmpi ne, %1, %c0_i32_0 : i32
    scf.if %2 {
      %cst_42 = arith.constant 0xFF800000 : f32
      %125 = vector.broadcast %cst_42 : f32 to vector<8x4xf32>
      %c0_43 = arith.constant 0 : index
      %c0_44 = arith.constant 0 : index
      %126 = vector.load %arg7[%c0_43, %c0_44] : memref<8x4xf32, #tpu.memory_space<vmem>>, vector<8x4xf32>
      tpu.vector_store %arg7[%c0_43, %c0_44], %125 {strides = array<i32>} : memref<8x4xf32, #tpu.memory_space<vmem>>, vector<8x4xf32>,
      %cst_45 = arith.constant 0.000000e+00 : f32
      %127 = vector.broadcast %cst_45 : f32 to vector<8x4xf32>
      %c0_46 = arith.constant 0 : index
      %c0_47 = arith.constant 0 : index
      %128 = vector.load %arg8[%c0_46, %c0_47] : memref<8x4xf32, #tpu.memory_space<vmem>>, vector<8x4xf32>
      tpu.vector_store %arg8[%c0_46, %c0_47], %127 {strides = array<i32>} : memref<8x4xf32, #tpu.memory_space<vmem>>, vector<8x4xf32>,
      %cst_48 = arith.constant 0.000000e+00 : f32
      %129 = vector.broadcast %cst_48 : f32 to vector<8x32xf32>
      %c0_49 = arith.constant 0 : index
      %c0_50 = arith.constant 0 : index
      %130 = vector.load %arg9[%c0_49, %c0_50] : memref<8x32xf32, #tpu.memory_space<vmem>>, vector<8x32xf32>
      tpu.vector_store %arg9[%c0_49, %c0_50], %129 {strides = array<i32>} : memref<8x32xf32, #tpu.memory_space<vmem>>, vector<8x32xf32>,
    } else {
    }
    %c0 = arith.constant 0 : index
    %c0_1 = arith.constant 0 : index
    %c0_2 = arith.constant 0 : index
    %3 = vector.load %arg3[%c0, %c0_1, %c0_2] : memref<1x8x32xbf16, #tpu.memory_space<vmem>>, vector<1x8x32xbf16>
    %4 = vector.shape_cast %3 : vector<1x8x32xbf16> to vector<8x32xbf16>
    %c0_3 = arith.constant 0 : index
    %c0_4 = arith.constant 0 : index
    %c0_5 = arith.constant 0 : index
    %5 = vector.load %arg4[%c0_3, %c0_4, %c0_5] : memref<1x8x32xbf16, #tpu.memory_space<vmem>>, vector<1x8x32xbf16>
    %6 = vector.shape_cast %5 : vector<1x8x32xbf16> to vector<8x32xbf16>
    %c0_6 = arith.constant 0 : index
    %c0_7 = arith.constant 0 : index
    %c0_8 = arith.constant 0 : index
    %7 = vector.load %arg5[%c0_6, %c0_7, %c0_8] : memref<1x8x32xbf16, #tpu.memory_space<vmem>>, vector<1x8x32xbf16>
    %8 = vector.shape_cast %7 : vector<1x8x32xbf16> to vector<8x32xbf16>
    %c0_9 = arith.constant 0 : index
    %c0_10 = arith.constant 0 : index
    %9 = vector.load %arg7[%c0_9, %c0_10] : memref<8x4xf32, #tpu.memory_space<vmem>>, vector<8x4xf32>
    %c0_11 = arith.constant 0 : index
    %c0_12 = arith.constant 0 : index
    %10 = vector.load %arg8[%c0_11, %c0_12] : memref<8x4xf32, #tpu.memory_space<vmem>>, vector<8x4xf32>
    %c0_13 = arith.constant 0 : index
    %c0_14 = arith.constant 0 : index
    %11 = vector.load %arg9[%c0_13, %c0_14] : memref<8x32xf32, #tpu.memory_space<vmem>>, vector<8x32xf32>
    %12 = vector.extract_strided_slice %4 {offsets = [0, 0], sizes = [8, 8], strides = [1, 1]} : vector<8x32xbf16> to vector<8x8xbf16>
    %cst = arith.constant 3.535160e-01 : bf16
    %13 = vector.broadcast %cst : bf16 to vector<8x8xbf16>
    %14 = arith.mulf %12, %13 : vector<8x8xbf16>
    %15 = vector.extract_strided_slice %6 {offsets = [0, 0], sizes = [8, 8], strides = [1, 1]} : vector<8x32xbf16> to vector<8x8xbf16>
    %cst_15 = arith.constant dense<0.000000e+00> : vector<8x8xf32>
    %16 = tpu.matmul %14, %15, %cst_15 {dimension_numbers = #tpu.dot_dimension_numbers<[1], [1], [0], [0], [0, 0, 1, 0], [], []>} : vector<8x8xbf16>, vector<8x8xbf16>, vector<8x8xf32> -> vector<8x8xf32>
    %17 = vector.extract_strided_slice %9 {offsets = [0, 0], sizes = [8, 1], strides = [1, 1]} : vector<8x4xf32> to vector<8x1xf32>
    %cst_16 = arith.constant dense<0xFF800000> : vector<8xf32>
    %18 = vector.multi_reduction <maximumf>, %16, %cst_16 [1] : vector<8x8xf32> to vector<8xf32>
    %19 = vector.shape_cast %18 : vector<8xf32> to vector<8x1xf32>
    %20 = arith.maximumf %17, %19 : vector<8x1xf32>
    %21 = arith.subf %17, %20 : vector<8x1xf32>
    %22 = math.exp %21 : vector<8x1xf32>
    %23 = vector.broadcast %20 : vector<8x1xf32> to vector<8x8xf32>
    %24 = arith.subf %16, %23 : vector<8x8xf32>
    %25 = math.exp %24 : vector<8x8xf32>
    %26 = vector.extract_strided_slice %10 {offsets = [0, 0], sizes = [8, 1], strides = [1, 1]} : vector<8x4xf32> to vector<8x1xf32>
    %27 = arith.mulf %22, %26 : vector<8x1xf32>
    %cst_17 = arith.constant dense<0.000000e+00> : vector<8xf32>
    %28 = vector.multi_reduction <add>, %25, %cst_17 [1] : vector<8x8xf32> to vector<8xf32>
    %29 = vector.shape_cast %28 : vector<8xf32> to vector<8x1xf32>
    %30 = arith.addf %27, %29 : vector<8x1xf32>
    %31 = arith.truncf %25 : vector<8x8xf32> to vector<8x8xbf16>
    %32 = vector.extract_strided_slice %8 {offsets = [0, 0], sizes = [8, 8], strides = [1, 1]} : vector<8x32xbf16> to vector<8x8xbf16>
    %cst_18 = arith.constant dense<0.000000e+00> : vector<8x8xf32>
    %33 = tpu.matmul %31, %32, %cst_18 {dimension_numbers = #tpu.dot_dimension_numbers<[1], [0], [0], [1], [0, 0, 1, 1], [], []>} : vector<8x8xbf16>, vector<8x8xbf16>, vector<8x8xf32> -> vector<8x8xf32>
    %34 = vector.extract_strided_slice %11 {offsets = [0, 0], sizes = [8, 8], strides = [1, 1]} : vector<8x32xf32> to vector<8x8xf32>
    %35 = vector.broadcast %22 : vector<8x1xf32> to vector<8x8xf32>
    %36 = arith.mulf %35, %34 : vector<8x8xf32>
    %37 = arith.addf %36, %33 : vector<8x8xf32>
    %38 = vector.extract_strided_slice %4 {offsets = [0, 8], sizes = [8, 8], strides = [1, 1]} : vector<8x32xbf16> to vector<8x8xbf16>
    %cst_19 = arith.constant 3.535160e-01 : bf16
    %39 = vector.broadcast %cst_19 : bf16 to vector<8x8xbf16>
    %40 = arith.mulf %38, %39 : vector<8x8xbf16>
    %41 = vector.extract_strided_slice %6 {offsets = [0, 8], sizes = [8, 8], strides = [1, 1]} : vector<8x32xbf16> to vector<8x8xbf16>
    %cst_20 = arith.constant dense<0.000000e+00> : vector<8x8xf32>
    %42 = tpu.matmul %40, %41, %cst_20 {dimension_numbers = #tpu.dot_dimension_numbers<[1], [1], [0], [0], [0, 0, 1, 0], [], []>} : vector<8x8xbf16>, vector<8x8xbf16>, vector<8x8xf32> -> vector<8x8xf32>
    %43 = vector.extract_strided_slice %9 {offsets = [0, 1], sizes = [8, 1], strides = [1, 1]} : vector<8x4xf32> to vector<8x1xf32>
    %cst_21 = arith.constant dense<0xFF800000> : vector<8xf32>
    %44 = vector.multi_reduction <maximumf>, %42, %cst_21 [1] : vector<8x8xf32> to vector<8xf32>
    %45 = vector.shape_cast %44 : vector<8xf32> to vector<8x1xf32>
    %46 = arith.maximumf %43, %45 : vector<8x1xf32>
    %47 = arith.subf %43, %46 : vector<8x1xf32>
    %48 = math.exp %47 : vector<8x1xf32>
    %49 = vector.broadcast %46 : vector<8x1xf32> to vector<8x8xf32>
    %50 = arith.subf %42, %49 : vector<8x8xf32>
    %51 = math.exp %50 : vector<8x8xf32>
    %52 = vector.extract_strided_slice %10 {offsets = [0, 1], sizes = [8, 1], strides = [1, 1]} : vector<8x4xf32> to vector<8x1xf32>
    %53 = arith.mulf %48, %52 : vector<8x1xf32>
    %cst_22 = arith.constant dense<0.000000e+00> : vector<8xf32>
    %54 = vector.multi_reduction <add>, %51, %cst_22 [1] : vector<8x8xf32> to vector<8xf32>
    %55 = vector.shape_cast %54 : vector<8xf32> to vector<8x1xf32>
    %56 = arith.addf %53, %55 : vector<8x1xf32>
    %57 = arith.truncf %51 : vector<8x8xf32> to vector<8x8xbf16>
    %58 = vector.extract_strided_slice %8 {offsets = [0, 8], sizes = [8, 8], strides = [1, 1]} : vector<8x32xbf16> to vector<8x8xbf16>
    %cst_23 = arith.constant dense<0.000000e+00> : vector<8x8xf32>
    %59 = tpu.matmul %57, %58, %cst_23 {dimension_numbers = #tpu.dot_dimension_numbers<[1], [0], [0], [1], [0, 0, 1, 1], [], []>} : vector<8x8xbf16>, vector<8x8xbf16>, vector<8x8xf32> -> vector<8x8xf32>
    %60 = vector.extract_strided_slice %11 {offsets = [0, 8], sizes = [8, 8], strides = [1, 1]} : vector<8x32xf32> to vector<8x8xf32>
    %61 = vector.broadcast %48 : vector<8x1xf32> to vector<8x8xf32>
    %62 = arith.mulf %61, %60 : vector<8x8xf32>
    %63 = arith.addf %62, %59 : vector<8x8xf32>
    %64 = vector.extract_strided_slice %4 {offsets = [0, 16], sizes = [8, 8], strides = [1, 1]} : vector<8x32xbf16> to vector<8x8xbf16>
    %cst_24 = arith.constant 3.535160e-01 : bf16
    %65 = vector.broadcast %cst_24 : bf16 to vector<8x8xbf16>
    %66 = arith.mulf %64, %65 : vector<8x8xbf16>
    %67 = vector.extract_strided_slice %6 {offsets = [0, 16], sizes = [8, 8], strides = [1, 1]} : vector<8x32xbf16> to vector<8x8xbf16>
    %cst_25 = arith.constant dense<0.000000e+00> : vector<8x8xf32>
    %68 = tpu.matmul %66, %67, %cst_25 {dimension_numbers = #tpu.dot_dimension_numbers<[1], [1], [0], [0], [0, 0, 1, 0], [], []>} : vector<8x8xbf16>, vector<8x8xbf16>, vector<8x8xf32> -> vector<8x8xf32>
    %69 = vector.extract_strided_slice %9 {offsets = [0, 2], sizes = [8, 1], strides = [1, 1]} : vector<8x4xf32> to vector<8x1xf32>
    %cst_26 = arith.constant dense<0xFF800000> : vector<8xf32>
    %70 = vector.multi_reduction <maximumf>, %68, %cst_26 [1] : vector<8x8xf32> to vector<8xf32>
    %71 = vector.shape_cast %70 : vector<8xf32> to vector<8x1xf32>
    %72 = arith.maximumf %69, %71 : vector<8x1xf32>
    %73 = arith.subf %69, %72 : vector<8x1xf32>
    %74 = math.exp %73 : vector<8x1xf32>
    %75 = vector.broadcast %72 : vector<8x1xf32> to vector<8x8xf32>
    %76 = arith.subf %68, %75 : vector<8x8xf32>
    %77 = math.exp %76 : vector<8x8xf32>
    %78 = vector.extract_strided_slice %10 {offsets = [0, 2], sizes = [8, 1], strides = [1, 1]} : vector<8x4xf32> to vector<8x1xf32>
    %79 = arith.mulf %74, %78 : vector<8x1xf32>
    %cst_27 = arith.constant dense<0.000000e+00> : vector<8xf32>
    %80 = vector.multi_reduction <add>, %77, %cst_27 [1] : vector<8x8xf32> to vector<8xf32>
    %81 = vector.shape_cast %80 : vector<8xf32> to vector<8x1xf32>
    %82 = arith.addf %79, %81 : vector<8x1xf32>
    %83 = arith.truncf %77 : vector<8x8xf32> to vector<8x8xbf16>
    %84 = vector.extract_strided_slice %8 {offsets = [0, 16], sizes = [8, 8], strides = [1, 1]} : vector<8x32xbf16> to vector<8x8xbf16>
    %cst_28 = arith.constant dense<0.000000e+00> : vector<8x8xf32>
    %85 = tpu.matmul %83, %84, %cst_28 {dimension_numbers = #tpu.dot_dimension_numbers<[1], [0], [0], [1], [0, 0, 1, 1], [], []>} : vector<8x8xbf16>, vector<8x8xbf16>, vector<8x8xf32> -> vector<8x8xf32>
    %86 = vector.extract_strided_slice %11 {offsets = [0, 16], sizes = [8, 8], strides = [1, 1]} : vector<8x32xf32> to vector<8x8xf32>
    %87 = vector.broadcast %74 : vector<8x1xf32> to vector<8x8xf32>
    %88 = arith.mulf %87, %86 : vector<8x8xf32>
    %89 = arith.addf %88, %85 : vector<8x8xf32>
    %90 = vector.extract_strided_slice %4 {offsets = [0, 24], sizes = [8, 8], strides = [1, 1]} : vector<8x32xbf16> to vector<8x8xbf16>
    %cst_29 = arith.constant 3.535160e-01 : bf16
    %91 = vector.broadcast %cst_29 : bf16 to vector<8x8xbf16>
    %92 = arith.mulf %90, %91 : vector<8x8xbf16>
    %93 = vector.extract_strided_slice %6 {offsets = [0, 24], sizes = [8, 8], strides = [1, 1]} : vector<8x32xbf16> to vector<8x8xbf16>
    %cst_30 = arith.constant dense<0.000000e+00> : vector<8x8xf32>
    %94 = tpu.matmul %92, %93, %cst_30 {dimension_numbers = #tpu.dot_dimension_numbers<[1], [1], [0], [0], [0, 0, 1, 0], [], []>} : vector<8x8xbf16>, vector<8x8xbf16>, vector<8x8xf32> -> vector<8x8xf32>
    %95 = vector.extract_strided_slice %9 {offsets = [0, 3], sizes = [8, 1], strides = [1, 1]} : vector<8x4xf32> to vector<8x1xf32>
    %cst_31 = arith.constant dense<0xFF800000> : vector<8xf32>
    %96 = vector.multi_reduction <maximumf>, %94, %cst_31 [1] : vector<8x8xf32> to vector<8xf32>
    %97 = vector.shape_cast %96 : vector<8xf32> to vector<8x1xf32>
    %98 = arith.maximumf %95, %97 : vector<8x1xf32>
    %99 = arith.subf %95, %98 : vector<8x1xf32>
    %100 = math.exp %99 : vector<8x1xf32>
    %101 = vector.broadcast %98 : vector<8x1xf32> to vector<8x8xf32>
    %102 = arith.subf %94, %101 : vector<8x8xf32>
    %103 = math.exp %102 : vector<8x8xf32>
    %104 = vector.extract_strided_slice %10 {offsets = [0, 3], sizes = [8, 1], strides = [1, 1]} : vector<8x4xf32> to vector<8x1xf32>
    %105 = arith.mulf %100, %104 : vector<8x1xf32>
    %cst_32 = arith.constant dense<0.000000e+00> : vector<8xf32>
    %106 = vector.multi_reduction <add>, %103, %cst_32 [1] : vector<8x8xf32> to vector<8xf32>
    %107 = vector.shape_cast %106 : vector<8xf32> to vector<8x1xf32>
    %108 = arith.addf %105, %107 : vector<8x1xf32>
    %109 = arith.truncf %103 : vector<8x8xf32> to vector<8x8xbf16>
    %110 = vector.extract_strided_slice %8 {offsets = [0, 24], sizes = [8, 8], strides = [1, 1]} : vector<8x32xbf16> to vector<8x8xbf16>
    %cst_33 = arith.constant dense<0.000000e+00> : vector<8x8xf32>
    %111 = tpu.matmul %109, %110, %cst_33 {dimension_numbers = #tpu.dot_dimension_numbers<[1], [0], [0], [1], [0, 0, 1, 1], [], []>} : vector<8x8xbf16>, vector<8x8xbf16>, vector<8x8xf32> -> vector<8x8xf32>
    %112 = vector.extract_strided_slice %11 {offsets = [0, 24], sizes = [8, 8], strides = [1, 1]} : vector<8x32xf32> to vector<8x8xf32>
    %113 = vector.broadcast %100 : vector<8x1xf32> to vector<8x8xf32>
    %114 = arith.mulf %113, %112 : vector<8x8xf32>
    %115 = arith.addf %114, %111 : vector<8x8xf32>
    %116 = tpu.concatenate %20, %46, %72, %98 in 1 : vector<8x1xf32>, vector<8x1xf32>, vector<8x1xf32>, vector<8x1xf32> -> vector<8x4xf32>
    %c0_34 = arith.constant 0 : index
    %c0_35 = arith.constant 0 : index
    %117 = vector.load %arg7[%c0_34, %c0_35] : memref<8x4xf32, #tpu.memory_space<vmem>>, vector<8x4xf32>
    tpu.vector_store %arg7[%c0_34, %c0_35], %116 {strides = array<i32>} : memref<8x4xf32, #tpu.memory_space<vmem>>, vector<8x4xf32>,
    %118 = tpu.concatenate %30, %56, %82, %108 in 1 : vector<8x1xf32>, vector<8x1xf32>, vector<8x1xf32>, vector<8x1xf32> -> vector<8x4xf32>
    %c0_36 = arith.constant 0 : index
    %c0_37 = arith.constant 0 : index
    %119 = vector.load %arg8[%c0_36, %c0_37] : memref<8x4xf32, #tpu.memory_space<vmem>>, vector<8x4xf32>
    tpu.vector_store %arg8[%c0_36, %c0_37], %118 {strides = array<i32>} : memref<8x4xf32, #tpu.memory_space<vmem>>, vector<8x4xf32>,
    %120 = tpu.concatenate %37, %63, %89, %115 in 1 : vector<8x8xf32>, vector<8x8xf32>, vector<8x8xf32>, vector<8x8xf32> -> vector<8x32xf32>
    %c0_38 = arith.constant 0 : index
    %c0_39 = arith.constant 0 : index
    %121 = vector.load %arg9[%c0_38, %c0_39] : memref<8x32xf32, #tpu.memory_space<vmem>>, vector<8x32xf32>
    tpu.vector_store %arg9[%c0_38, %c0_39], %120 {strides = array<i32>} : memref<8x32xf32, #tpu.memory_space<vmem>>, vector<8x32xf32>,
    %c0_i32_40 = arith.constant 0 : i32
    %122 = arith.cmpi eq, %arg2, %c0_i32_40 : i32
    %123 = arith.extui %122 : i1 to i32
    %c0_i32_41 = arith.constant 0 : i32
    %124 = arith.cmpi ne, %123, %c0_i32_41 : i32
    scf.if %124 {
      %c0_42 = arith.constant 0 : index
      %c0_43 = arith.constant 0 : index
      %125 = vector.load %arg8[%c0_42, %c0_43] : memref<8x4xf32, #tpu.memory_space<vmem>>, vector<8x4xf32>
      %c0_44 = arith.constant 0 : index
      %c0_45 = arith.constant 0 : index
      %126 = vector.load %arg9[%c0_44, %c0_45] : memref<8x32xf32, #tpu.memory_space<vmem>>, vector<8x32xf32>
      %127 = vector.extract_strided_slice %126 {offsets = [0, 0], sizes = [8, 8], strides = [1, 1]} : vector<8x32xf32> to vector<8x8xf32>
      %128 = vector.extract_strided_slice %125 {offsets = [0, 0], sizes = [8, 1], strides = [1, 1]} : vector<8x4xf32> to vector<8x1xf32>
      %129 = tpu.reciprocal %128 {approx = true} : vector<8x1xf32> -> vector<8x1xf32>
      %130 = vector.broadcast %129 : vector<8x1xf32> to vector<8x8xf32>
      %131 = arith.mulf %127, %130 : vector<8x8xf32>
      %132 = vector.extract_strided_slice %126 {offsets = [0, 8], sizes = [8, 8], strides = [1, 1]} : vector<8x32xf32> to vector<8x8xf32>
      %133 = vector.extract_strided_slice %125 {offsets = [0, 1], sizes = [8, 1], strides = [1, 1]} : vector<8x4xf32> to vector<8x1xf32>
      %134 = tpu.reciprocal %133 {approx = true} : vector<8x1xf32> -> vector<8x1xf32>
      %135 = vector.broadcast %134 : vector<8x1xf32> to vector<8x8xf32>
      %136 = arith.mulf %132, %135 : vector<8x8xf32>
      %137 = vector.extract_strided_slice %126 {offsets = [0, 16], sizes = [8, 8], strides = [1, 1]} : vector<8x32xf32> to vector<8x8xf32>
      %138 = vector.extract_strided_slice %125 {offsets = [0, 2], sizes = [8, 1], strides = [1, 1]} : vector<8x4xf32> to vector<8x1xf32>
      %139 = tpu.reciprocal %138 {approx = true} : vector<8x1xf32> -> vector<8x1xf32>
      %140 = vector.broadcast %139 : vector<8x1xf32> to vector<8x8xf32>
      %141 = arith.mulf %137, %140 : vector<8x8xf32>
      %142 = vector.extract_strided_slice %126 {offsets = [0, 24], sizes = [8, 8], strides = [1, 1]} : vector<8x32xf32> to vector<8x8xf32>
      %143 = vector.extract_strided_slice %125 {offsets = [0, 3], sizes = [8, 1], strides = [1, 1]} : vector<8x4xf32> to vector<8x1xf32>
      %144 = tpu.reciprocal %143 {approx = true} : vector<8x1xf32> -> vector<8x1xf32>
      %145 = vector.broadcast %144 : vector<8x1xf32> to vector<8x8xf32>
      %146 = arith.mulf %142, %145 : vector<8x8xf32>
      %147 = tpu.concatenate %131, %136, %141, %146 in 1 : vector<8x8xf32>, vector<8x8xf32>, vector<8x8xf32>, vector<8x8xf32> -> vector<8x32xf32>
      %148 = arith.truncf %147 : vector<8x32xf32> to vector<8x32xbf16>
      %c0_46 = arith.constant 0 : index
      %c0_47 = arith.constant 0 : index
      %c0_48 = arith.constant 0 : index
      %149 = vector.load %arg6[%c0_46, %c0_47, %c0_48] : memref<1x8x32xbf16, #tpu.memory_space<vmem>>, vector<1x8x32xbf16>
      %150 = vector.shape_cast %149 : vector<1x8x32xbf16> to vector<8x32xbf16>
      %151 = vector.shape_cast %148 : vector<8x32xbf16> to vector<1x8x32xbf16>
      tpu.vector_store %arg6[%c0_46, %c0_47, %c0_48], %151 {strides = array<i32>} : memref<1x8x32xbf16, #tpu.memory_space<vmem>>, vector<1x8x32xbf16>,
    } else {
    }
    return
  }
  func.func @transform_0(%arg0: i32, %arg1: i32, %arg2: i32) -> (i32, i32, i32) {
    %c0_i32 = arith.constant 0 : i32
    %c0_i32_0 = arith.constant 0 : i32
    return %arg0, %arg1, %c0_i32 : i32, i32, i32
  }
  func.func @transform_1(%arg0: i32, %arg1: i32, %arg2: i32) -> (i32, i32, i32) {
    %c0_i32 = arith.constant 0 : i32
    %c0_i32_0 = arith.constant 0 : i32
    return %arg0, %arg2, %c0_i32 : i32, i32, i32
  }
  func.func @transform_2(%arg0: i32, %arg1: i32, %arg2: i32) -> (i32, i32, i32) {
    %c0_i32 = arith.constant 0 : i32
    %c0_i32_0 = arith.constant 0 : i32
    return %arg0, %arg2, %c0_i32 : i32, i32, i32
  }
  func.func @transform_3(%arg0: i32, %arg1: i32, %arg2: i32) -> (i32, i32, i32) {
    %c0_i32 = arith.constant 0 : i32
    %c0_i32_0 = arith.constant 0 : i32
    return %arg0, %arg1, %c0_i32 : i32, i32, i32
  }
}

module attributes {stable_mosaic.version = 11 : i64} {
  func.func @_linear_kernel(%arg0: i32, %arg1: i32, %arg2: i32, %arg3: memref<16x32xbf16, #tpu.memory_space<vmem>>, %arg4: memref<32x32xbf16, #tpu.memory_space<vmem>>, %arg5: memref<1x32xf32, #tpu.memory_space<vmem>>, %arg6: memref<16x32xbf16, #tpu.memory_space<vmem>>, %arg7: memref<16x32xf32, #tpu.memory_space<vmem>>) attributes {dimension_semantics = [#tpu.dimension_semantics<parallel>, #tpu.dimension_semantics<parallel>, #tpu.dimension_semantics<arbitrary>], iteration_bounds = array<i64: 1, 1, 1>, scalar_prefetch = 0 : i64, scratch_operands = 1 : i64, tpu.core_type = #tpu.core_type<tc>, window_params = [{transform_indices = @transform_0, window_bounds = array<i64: 16, 32>}, {transform_indices = @transform_1, window_bounds = array<i64: 32, 32>}, {transform_indices = @transform_2, window_bounds = array<i64: 1, 32>}, {transform_indices = @transform_3, window_bounds = array<i64: 16, 32>}]} {
    %c0_i32 = arith.constant 0 : i32
    %0 = arith.cmpi eq, %arg2, %c0_i32 : i32
    %1 = arith.extui %0 : i1 to i32
    %c0_i32_0 = arith.constant 0 : i32
    %2 = arith.cmpi ne, %1, %c0_i32_0 : i32
    scf.if %2 {
      %cst_10 = arith.constant 0.000000e+00 : f32
      %12 = vector.broadcast %cst_10 : f32 to vector<16x32xf32>
      %c0_11 = arith.constant 0 : index
      %c0_12 = arith.constant 0 : index
      %13 = vector.load %arg7[%c0_11, %c0_12] : memref<16x32xf32, #tpu.memory_space<vmem>>, vector<16x32xf32>
      tpu.vector_store %arg7[%c0_11, %c0_12], %12 {strides = array<i32>} : memref<16x32xf32, #tpu.memory_space<vmem>>, vector<16x32xf32>,
    } else {
    }
    %c0 = arith.constant 0 : index
    %c0_1 = arith.constant 0 : index
    %3 = vector.load %arg7[%c0, %c0_1] : memref<16x32xf32, #tpu.memory_space<vmem>>, vector<16x32xf32>
    %c0_2 = arith.constant 0 : index
    %c0_3 = arith.constant 0 : index
    %4 = vector.load %arg3[%c0_2, %c0_3] : memref<16x32xbf16, #tpu.memory_space<vmem>>, vector<16x32xbf16>
    %c0_4 = arith.constant 0 : index
    %c0_5 = arith.constant 0 : index
    %5 = vector.load %arg4[%c0_4, %c0_5] : memref<32x32xbf16, #tpu.memory_space<vmem>>, vector<32x32xbf16>
    %cst = arith.constant dense<0.000000e+00> : vector<16x32xf32>
    %6 = tpu.matmul %4, %5, %cst {dimension_numbers = #tpu.dot_dimension_numbers<[1], [0], [0], [1], [0, 0, 1, 1], [], []>} : vector<16x32xbf16>, vector<32x32xbf16>, vector<16x32xf32> -> vector<16x32xf32>
    %7 = arith.addf %3, %6 : vector<16x32xf32>
    %c0_6 = arith.constant 0 : index
    %c0_7 = arith.constant 0 : index
    %8 = vector.load %arg7[%c0_6, %c0_7] : memref<16x32xf32, #tpu.memory_space<vmem>>, vector<16x32xf32>
    tpu.vector_store %arg7[%c0_6, %c0_7], %7 {strides = array<i32>} : memref<16x32xf32, #tpu.memory_space<vmem>>, vector<16x32xf32>,
    %c0_i32_8 = arith.constant 0 : i32
    %9 = arith.cmpi eq, %arg2, %c0_i32_8 : i32
    %10 = arith.extui %9 : i1 to i32
    %c0_i32_9 = arith.constant 0 : i32
    %11 = arith.cmpi ne, %10, %c0_i32_9 : i32
    scf.if %11 {
      %c0_10 = arith.constant 0 : index
      %c0_11 = arith.constant 0 : index
      %12 = vector.load %arg7[%c0_10, %c0_11] : memref<16x32xf32, #tpu.memory_space<vmem>>, vector<16x32xf32>
      %c0_12 = arith.constant 0 : index
      %c0_13 = arith.constant 0 : index
      %13 = vector.load %arg5[%c0_12, %c0_13] : memref<1x32xf32, #tpu.memory_space<vmem>>, vector<1x32xf32>
      %14 = vector.broadcast %13 : vector<1x32xf32> to vector<16x32xf32>
      %15 = arith.addf %12, %14 : vector<16x32xf32>
      %16 = arith.truncf %15 : vector<16x32xf32> to vector<16x32xbf16>
      %c0_14 = arith.constant 0 : index
      %c0_15 = arith.constant 0 : index
      %17 = vector.load %arg6[%c0_14, %c0_15] : memref<16x32xbf16, #tpu.memory_space<vmem>>, vector<16x32xbf16>
      tpu.vector_store %arg6[%c0_14, %c0_15], %16 {strides = array<i32>} : memref<16x32xbf16, #tpu.memory_space<vmem>>, vector<16x32xbf16>,
    } else {
    }
    return
  }
  func.func @transform_0(%arg0: i32, %arg1: i32, %arg2: i32) -> (i32, i32) {
    %c0_i32 = arith.constant 0 : i32
    return %arg0, %arg2 : i32, i32
  }
  func.func @transform_1(%arg0: i32, %arg1: i32, %arg2: i32) -> (i32, i32) {
    %c0_i32 = arith.constant 0 : i32
    return %arg2, %arg1 : i32, i32
  }
  func.func @transform_2(%arg0: i32, %arg1: i32, %arg2: i32) -> (i32, i32) {
    %c0_i32 = arith.constant 0 : i32
    %c0_i32_0 = arith.constant 0 : i32
    return %c0_i32, %arg1 : i32, i32
  }
  func.func @transform_3(%arg0: i32, %arg1: i32, %arg2: i32) -> (i32, i32) {
    %c0_i32 = arith.constant 0 : i32
    return %arg0, %arg1 : i32, i32
  }
}

module attributes {stable_mosaic.version = 11 : i64} {
  func.func @_linear_res_ln_kernel(%arg0: i32, %arg1: i32, %arg2: memref<16x32xbf16, #tpu.memory_space<vmem>>, %arg3: memref<32x32xbf16, #tpu.memory_space<vmem>>, %arg4: memref<1x32xf32, #tpu.memory_space<vmem>>, %arg5: memref<16x32xbf16, #tpu.memory_space<vmem>>, %arg6: memref<1x32xf32, #tpu.memory_space<vmem>>, %arg7: memref<1x32xf32, #tpu.memory_space<vmem>>, %arg8: memref<16x32xbf16, #tpu.memory_space<vmem>>, %arg9: memref<16x32xf32, #tpu.memory_space<vmem>>) attributes {dimension_semantics = [#tpu.dimension_semantics<parallel>, #tpu.dimension_semantics<arbitrary>], iteration_bounds = array<i64: 1, 1>, scalar_prefetch = 0 : i64, scratch_operands = 1 : i64, tpu.core_type = #tpu.core_type<tc>, window_params = [{transform_indices = @transform_0, window_bounds = array<i64: 16, 32>}, {transform_indices = @transform_1, window_bounds = array<i64: 32, 32>}, {pipeline_mode = #tpu.pipeline_mode<synchronous>, transform_indices = @transform_2, window_bounds = array<i64: 1, 32>}, {transform_indices = @transform_3, window_bounds = array<i64: 16, 32>}, {pipeline_mode = #tpu.pipeline_mode<synchronous>, transform_indices = @transform_4, window_bounds = array<i64: 1, 32>}, {pipeline_mode = #tpu.pipeline_mode<synchronous>, transform_indices = @transform_5, window_bounds = array<i64: 1, 32>}, {transform_indices = @transform_6, window_bounds = array<i64: 16, 32>}]} {
    %c0_i32 = arith.constant 0 : i32
    %0 = arith.cmpi eq, %arg1, %c0_i32 : i32
    %1 = arith.extui %0 : i1 to i32
    %c0_i32_0 = arith.constant 0 : i32
    %2 = arith.cmpi ne, %1, %c0_i32_0 : i32
    scf.if %2 {
      %cst_10 = arith.constant 0.000000e+00 : f32
      %12 = vector.broadcast %cst_10 : f32 to vector<16x32xf32>
      %c0_11 = arith.constant 0 : index
      %c0_12 = arith.constant 0 : index
      %13 = vector.load %arg9[%c0_11, %c0_12] : memref<16x32xf32, #tpu.memory_space<vmem>>, vector<16x32xf32>
      tpu.vector_store %arg9[%c0_11, %c0_12], %12 {strides = array<i32>} : memref<16x32xf32, #tpu.memory_space<vmem>>, vector<16x32xf32>,
    } else {
    }
    %c0 = arith.constant 0 : index
    %c0_1 = arith.constant 0 : index
    %3 = vector.load %arg9[%c0, %c0_1] : memref<16x32xf32, #tpu.memory_space<vmem>>, vector<16x32xf32>
    %c0_2 = arith.constant 0 : index
    %c0_3 = arith.constant 0 : index
    %4 = vector.load %arg2[%c0_2, %c0_3] : memref<16x32xbf16, #tpu.memory_space<vmem>>, vector<16x32xbf16>
    %c0_4 = arith.constant 0 : index
    %c0_5 = arith.constant 0 : index
    %5 = vector.load %arg3[%c0_4, %c0_5] : memref<32x32xbf16, #tpu.memory_space<vmem>>, vector<32x32xbf16>
    %cst = arith.constant dense<0.000000e+00> : vector<16x32xf32>
    %6 = tpu.matmul %4, %5, %cst {dimension_numbers = #tpu.dot_dimension_numbers<[1], [0], [0], [1], [0, 0, 1, 1], [], []>} : vector<16x32xbf16>, vector<32x32xbf16>, vector<16x32xf32> -> vector<16x32xf32>
    %7 = arith.addf %3, %6 : vector<16x32xf32>
    %c0_6 = arith.constant 0 : index
    %c0_7 = arith.constant 0 : index
    %8 = vector.load %arg9[%c0_6, %c0_7] : memref<16x32xf32, #tpu.memory_space<vmem>>, vector<16x32xf32>
    tpu.vector_store %arg9[%c0_6, %c0_7], %7 {strides = array<i32>} : memref<16x32xf32, #tpu.memory_space<vmem>>, vector<16x32xf32>,
    %c0_i32_8 = arith.constant 0 : i32
    %9 = arith.cmpi eq, %arg1, %c0_i32_8 : i32
    %10 = arith.extui %9 : i1 to i32
    %c0_i32_9 = arith.constant 0 : i32
    %11 = arith.cmpi ne, %10, %c0_i32_9 : i32
    scf.if %11 {
      %c0_10 = arith.constant 0 : index
      %c0_11 = arith.constant 0 : index
      %12 = vector.load %arg9[%c0_10, %c0_11] : memref<16x32xf32, #tpu.memory_space<vmem>>, vector<16x32xf32>
      %c0_12 = arith.constant 0 : index
      %c0_13 = arith.constant 0 : index
      %13 = vector.load %arg4[%c0_12, %c0_13] : memref<1x32xf32, #tpu.memory_space<vmem>>, vector<1x32xf32>
      %14 = vector.broadcast %13 : vector<1x32xf32> to vector<16x32xf32>
      %15 = arith.addf %12, %14 : vector<16x32xf32>
      %c0_14 = arith.constant 0 : index
      %c0_15 = arith.constant 0 : index
      %16 = vector.load %arg5[%c0_14, %c0_15] : memref<16x32xbf16, #tpu.memory_space<vmem>>, vector<16x32xbf16>
      %17 = arith.extf %16 : vector<16x32xbf16> to vector<16x32xf32>
      %18 = arith.addf %15, %17 : vector<16x32xf32>
      %cst_16 = arith.constant dense<0.000000e+00> : vector<16xf32>
      %19 = vector.multi_reduction <add>, %18, %cst_16 [1] : vector<16x32xf32> to vector<16xf32>
      %20 = vector.shape_cast %19 : vector<16xf32> to vector<16x1xf32>
      %cst_17 = arith.constant 3.200000e+01 : f32
      %21 = vector.broadcast %cst_17 : f32 to vector<16x1xf32>
      %22 = arith.divf %20, %21 : vector<16x1xf32>
      %23 = vector.broadcast %22 : vector<16x1xf32> to vector<16x32xf32>
      %24 = arith.subf %18, %23 : vector<16x32xf32>
      %25 = arith.mulf %24, %24 : vector<16x32xf32>
      %cst_18 = arith.constant dense<0.000000e+00> : vector<16xf32>
      %26 = vector.multi_reduction <add>, %25, %cst_18 [1] : vector<16x32xf32> to vector<16xf32>
      %27 = vector.shape_cast %26 : vector<16xf32> to vector<16x1xf32>
      %cst_19 = arith.constant 3.200000e+01 : f32
      %28 = vector.broadcast %cst_19 : f32 to vector<16x1xf32>
      %29 = arith.divf %27, %28 : vector<16x1xf32>
      %30 = vector.broadcast %22 : vector<16x1xf32> to vector<16x32xf32>
      %31 = arith.subf %18, %30 : vector<16x32xf32>
      %cst_20 = arith.constant 9.99999974E-6 : f32
      %32 = vector.broadcast %cst_20 : f32 to vector<16x1xf32>
      %33 = arith.addf %29, %32 : vector<16x1xf32>
      %34 = math.rsqrt %33 : vector<16x1xf32>
      %35 = vector.broadcast %34 : vector<16x1xf32> to vector<16x32xf32>
      %36 = arith.mulf %31, %35 : vector<16x32xf32>
      %c0_21 = arith.constant 0 : index
      %c0_22 = arith.constant 0 : index
      %37 = vector.load %arg6[%c0_21, %c0_22] : memref<1x32xf32, #tpu.memory_space<vmem>>, vector<1x32xf32>
      %38 = vector.broadcast %37 : vector<1x32xf32> to vector<16x32xf32>
      %39 = arith.mulf %36, %38 : vector<16x32xf32>
      %c0_23 = arith.constant 0 : index
      %c0_24 = arith.constant 0 : index
      %40 = vector.load %arg7[%c0_23, %c0_24] : memref<1x32xf32, #tpu.memory_space<vmem>>, vector<1x32xf32>
      %41 = vector.broadcast %40 : vector<1x32xf32> to vector<16x32xf32>
      %42 = arith.addf %39, %41 : vector<16x32xf32>
      %43 = arith.truncf %42 : vector<16x32xf32> to vector<16x32xbf16>
      %c0_25 = arith.constant 0 : index
      %c0_26 = arith.constant 0 : index
      %44 = vector.load %arg8[%c0_25, %c0_26] : memref<16x32xbf16, #tpu.memory_space<vmem>>, vector<16x32xbf16>
      tpu.vector_store %arg8[%c0_25, %c0_26], %43 {strides = array<i32>} : memref<16x32xbf16, #tpu.memory_space<vmem>>, vector<16x32xbf16>,
    } else {
    }
    return
  }
  func.func @transform_0(%arg0: i32, %arg1: i32) -> (i32, i32) {
    %c0_i32 = arith.constant 0 : i32
    return %arg0, %arg1 : i32, i32
  }
  func.func @transform_1(%arg0: i32, %arg1: i32) -> (i32, i32) {
    %c0_i32 = arith.constant 0 : i32
    %c0_i32_0 = arith.constant 0 : i32
    return %arg1, %c0_i32 : i32, i32
  }
  func.func @transform_2(%arg0: i32, %arg1: i32) -> (i32, i32) {
    %c0_i32 = arith.constant 0 : i32
    %c0_i32_0 = arith.constant 0 : i32
    %c0_i32_1 = arith.constant 0 : i32
    return %c0_i32, %c0_i32_0 : i32, i32
  }
  func.func @transform_3(%arg0: i32, %arg1: i32) -> (i32, i32) {
    %c0_i32 = arith.constant 0 : i32
    %c0_i32_0 = arith.constant 0 : i32
    return %arg0, %c0_i32 : i32, i32
  }
  func.func @transform_4(%arg0: i32, %arg1: i32) -> (i32, i32) {
    %c0_i32 = arith.constant 0 : i32
    %c0_i32_0 = arith.constant 0 : i32
    %c0_i32_1 = arith.constant 0 : i32
    return %c0_i32, %c0_i32_0 : i32, i32
  }
  func.func @transform_5(%arg0: i32, %arg1: i32) -> (i32, i32) {
    %c0_i32 = arith.constant 0 : i32
    %c0_i32_0 = arith.constant 0 : i32
    %c0_i32_1 = arith.constant 0 : i32
    return %c0_i32, %c0_i32_0 : i32, i32
  }
  func.func @transform_6(%arg0: i32, %arg1: i32) -> (i32, i32) {
    %c0_i32 = arith.constant 0 : i32
    %c0_i32_0 = arith.constant 0 : i32
    return %arg0, %c0_i32 : i32, i32
  }
}

module attributes {stable_mosaic.version = 11 : i64} {
  func.func @_ffn_res_ln_kernel(%arg0: i32, %arg1: memref<16x32xbf16, #tpu.memory_space<vmem>>, %arg2: memref<32x2048xbf16, #tpu.memory_space<vmem>>, %arg3: memref<1x2048xf32, #tpu.memory_space<vmem>>, %arg4: memref<2048x32xbf16, #tpu.memory_space<vmem>>, %arg5: memref<1x32xf32, #tpu.memory_space<vmem>>, %arg6: memref<1x32xf32, #tpu.memory_space<vmem>>, %arg7: memref<1x32xf32, #tpu.memory_space<vmem>>, %arg8: memref<16x32xbf16, #tpu.memory_space<vmem>>) attributes {dimension_semantics = [#tpu.dimension_semantics<parallel>], iteration_bounds = array<i64: 1>, scalar_prefetch = 0 : i64, scratch_operands = 0 : i64, tpu.core_type = #tpu.core_type<tc>, window_params = [{transform_indices = @transform_0, window_bounds = array<i64: 16, 32>}, {pipeline_mode = #tpu.pipeline_mode<synchronous>, transform_indices = @transform_1, window_bounds = array<i64: 32, 2048>}, {pipeline_mode = #tpu.pipeline_mode<synchronous>, transform_indices = @transform_2, window_bounds = array<i64: 1, 2048>}, {pipeline_mode = #tpu.pipeline_mode<synchronous>, transform_indices = @transform_3, window_bounds = array<i64: 2048, 32>}, {pipeline_mode = #tpu.pipeline_mode<synchronous>, transform_indices = @transform_4, window_bounds = array<i64: 1, 32>}, {pipeline_mode = #tpu.pipeline_mode<synchronous>, transform_indices = @transform_5, window_bounds = array<i64: 1, 32>}, {pipeline_mode = #tpu.pipeline_mode<synchronous>, transform_indices = @transform_6, window_bounds = array<i64: 1, 32>}, {transform_indices = @transform_7, window_bounds = array<i64: 16, 32>}]} {
    %c0 = arith.constant 0 : index
    %c0_0 = arith.constant 0 : index
    %0 = vector.load %arg1[%c0, %c0_0] : memref<16x32xbf16, #tpu.memory_space<vmem>>, vector<16x32xbf16>
    %c0_1 = arith.constant 0 : index
    %c0_2 = arith.constant 0 : index
    %1 = vector.load %arg2[%c0_1, %c0_2] : memref<32x2048xbf16, #tpu.memory_space<vmem>>, vector<32x2048xbf16>
    %cst = arith.constant dense<0.000000e+00> : vector<16x2048xf32>
    %2 = tpu.matmul %0, %1, %cst {dimension_numbers = #tpu.dot_dimension_numbers<[1], [0], [0], [1], [0, 0, 1, 1], [], []>} : vector<16x32xbf16>, vector<32x2048xbf16>, vector<16x2048xf32> -> vector<16x2048xf32>
    %c0_3 = arith.constant 0 : index
    %c0_4 = arith.constant 0 : index
    %3 = vector.load %arg3[%c0_3, %c0_4] : memref<1x2048xf32, #tpu.memory_space<vmem>>, vector<1x2048xf32>
    %4 = vector.broadcast %3 : vector<1x2048xf32> to vector<16x2048xf32>
    %5 = arith.addf %2, %4 : vector<16x2048xf32>
    %cst_5 = arith.constant 0.000000e+00 : f32
    %6 = vector.broadcast %cst_5 : f32 to vector<16x2048xf32>
    %7 = arith.maximumf %5, %6 : vector<16x2048xf32>
    %8 = arith.truncf %7 : vector<16x2048xf32> to vector<16x2048xbf16>
    %c0_6 = arith.constant 0 : index
    %c0_7 = arith.constant 0 : index
    %9 = vector.load %arg4[%c0_6, %c0_7] : memref<2048x32xbf16, #tpu.memory_space<vmem>>, vector<2048x32xbf16>
    %cst_8 = arith.constant dense<0.000000e+00> : vector<16x32xf32>
    %10 = tpu.matmul %8, %9, %cst_8 {dimension_numbers = #tpu.dot_dimension_numbers<[1], [0], [0], [1], [0, 0, 1, 1], [], []>} : vector<16x2048xbf16>, vector<2048x32xbf16>, vector<16x32xf32> -> vector<16x32xf32>
    %c0_9 = arith.constant 0 : index
    %c0_10 = arith.constant 0 : index
    %11 = vector.load %arg5[%c0_9, %c0_10] : memref<1x32xf32, #tpu.memory_space<vmem>>, vector<1x32xf32>
    %12 = vector.broadcast %11 : vector<1x32xf32> to vector<16x32xf32>
    %13 = arith.addf %10, %12 : vector<16x32xf32>
    %14 = arith.extf %0 : vector<16x32xbf16> to vector<16x32xf32>
    %15 = arith.addf %13, %14 : vector<16x32xf32>
    %cst_11 = arith.constant dense<0.000000e+00> : vector<16xf32>
    %16 = vector.multi_reduction <add>, %15, %cst_11 [1] : vector<16x32xf32> to vector<16xf32>
    %17 = vector.shape_cast %16 : vector<16xf32> to vector<16x1xf32>
    %cst_12 = arith.constant 3.200000e+01 : f32
    %18 = vector.broadcast %cst_12 : f32 to vector<16x1xf32>
    %19 = arith.divf %17, %18 : vector<16x1xf32>
    %20 = vector.broadcast %19 : vector<16x1xf32> to vector<16x32xf32>
    %21 = arith.subf %15, %20 : vector<16x32xf32>
    %22 = arith.mulf %21, %21 : vector<16x32xf32>
    %cst_13 = arith.constant dense<0.000000e+00> : vector<16xf32>
    %23 = vector.multi_reduction <add>, %22, %cst_13 [1] : vector<16x32xf32> to vector<16xf32>
    %24 = vector.shape_cast %23 : vector<16xf32> to vector<16x1xf32>
    %cst_14 = arith.constant 3.200000e+01 : f32
    %25 = vector.broadcast %cst_14 : f32 to vector<16x1xf32>
    %26 = arith.divf %24, %25 : vector<16x1xf32>
    %27 = vector.broadcast %19 : vector<16x1xf32> to vector<16x32xf32>
    %28 = arith.subf %15, %27 : vector<16x32xf32>
    %cst_15 = arith.constant 9.99999974E-6 : f32
    %29 = vector.broadcast %cst_15 : f32 to vector<16x1xf32>
    %30 = arith.addf %26, %29 : vector<16x1xf32>
    %31 = math.rsqrt %30 : vector<16x1xf32>
    %32 = vector.broadcast %31 : vector<16x1xf32> to vector<16x32xf32>
    %33 = arith.mulf %28, %32 : vector<16x32xf32>
    %c0_16 = arith.constant 0 : index
    %c0_17 = arith.constant 0 : index
    %34 = vector.load %arg6[%c0_16, %c0_17] : memref<1x32xf32, #tpu.memory_space<vmem>>, vector<1x32xf32>
    %35 = vector.broadcast %34 : vector<1x32xf32> to vector<16x32xf32>
    %36 = arith.mulf %33, %35 : vector<16x32xf32>
    %c0_18 = arith.constant 0 : index
    %c0_19 = arith.constant 0 : index
    %37 = vector.load %arg7[%c0_18, %c0_19] : memref<1x32xf32, #tpu.memory_space<vmem>>, vector<1x32xf32>
    %38 = vector.broadcast %37 : vector<1x32xf32> to vector<16x32xf32>
    %39 = arith.addf %36, %38 : vector<16x32xf32>
    %40 = arith.truncf %39 : vector<16x32xf32> to vector<16x32xbf16>
    %c0_20 = arith.constant 0 : index
    %c0_21 = arith.constant 0 : index
    %41 = vector.load %arg8[%c0_20, %c0_21] : memref<16x32xbf16, #tpu.memory_space<vmem>>, vector<16x32xbf16>
    tpu.vector_store %arg8[%c0_20, %c0_21], %40 {strides = array<i32>} : memref<16x32xbf16, #tpu.memory_space<vmem>>, vector<16x32xbf16>,
    return
  }
  func.func @transform_0(%arg0: i32) -> (i32, i32) {
    %c0_i32 = arith.constant 0 : i32
    %c0_i32_0 = arith.constant 0 : i32
    return %arg0, %c0_i32 : i32, i32
  }
  func.func @transform_1(%arg0: i32) -> (i32, i32) {
    %c0_i32 = arith.constant 0 : i32
    %c0_i32_0 = arith.constant 0 : i32
    %c0_i32_1 = arith.constant 0 : i32
    return %c0_i32, %c0_i32_0 : i32, i32
  }
  func.func @transform_2(%arg0: i32) -> (i32, i32) {
    %c0_i32 = arith.constant 0 : i32
    %c0_i32_0 = arith.constant 0 : i32
    %c0_i32_1 = arith.constant 0 : i32
    return %c0_i32, %c0_i32_0 : i32, i32
  }
  func.func @transform_3(%arg0: i32) -> (i32, i32) {
    %c0_i32 = arith.constant 0 : i32
    %c0_i32_0 = arith.constant 0 : i32
    %c0_i32_1 = arith.constant 0 : i32
    return %c0_i32, %c0_i32_0 : i32, i32
  }
  func.func @transform_4(%arg0: i32) -> (i32, i32) {
    %c0_i32 = arith.constant 0 : i32
    %c0_i32_0 = arith.constant 0 : i32
    %c0_i32_1 = arith.constant 0 : i32
    return %c0_i32, %c0_i32_0 : i32, i32
  }
  func.func @transform_5(%arg0: i32) -> (i32, i32) {
    %c0_i32 = arith.constant 0 : i32
    %c0_i32_0 = arith.constant 0 : i32
    %c0_i32_1 = arith.constant 0 : i32
    return %c0_i32, %c0_i32_0 : i32, i32
  }
  func.func @transform_6(%arg0: i32) -> (i32, i32) {
    %c0_i32 = arith.constant 0 : i32
    %c0_i32_0 = arith.constant 0 : i32
    %c0_i32_1 = arith.constant 0 : i32
    return %c0_i32, %c0_i32_0 : i32, i32
  }
  func.func @transform_7(%arg0: i32) -> (i32, i32) {
    %c0_i32 = arith.constant 0 : i32
    %c0_i32_0 = arith.constant 0 : i32
    return %arg0, %c0_i32 : i32, i32
  }
}

module attributes {stable_mosaic.version = 11 : i64} {
  func.func @_mean_classifier_kernel(%arg0: i32, %arg1: memref<2x8x32xbf16, #tpu.memory_space<vmem>>, %arg2: memref<32x3xf32, #tpu.memory_space<vmem>>, %arg3: memref<1x3xf32, #tpu.memory_space<vmem>>, %arg4: memref<2x3xf32, #tpu.memory_space<vmem>>, %arg5: memref<2x32xf32, #tpu.memory_space<vmem>>) attributes {dimension_semantics = [#tpu.dimension_semantics<arbitrary>], iteration_bounds = array<i64: 1>, scalar_prefetch = 0 : i64, scratch_operands = 1 : i64, tpu.core_type = #tpu.core_type<tc>, window_params = [{transform_indices = @transform_0, window_bounds = array<i64: 2, 8, 32>}, {pipeline_mode = #tpu.pipeline_mode<synchronous>, transform_indices = @transform_1, window_bounds = array<i64: 32, 3>}, {pipeline_mode = #tpu.pipeline_mode<synchronous>, transform_indices = @transform_2, window_bounds = array<i64: 1, 3>}, {pipeline_mode = #tpu.pipeline_mode<synchronous>, transform_indices = @transform_3, window_bounds = array<i64: 2, 3>}]} {
    %c0_i32 = arith.constant 0 : i32
    %0 = arith.cmpi eq, %arg0, %c0_i32 : i32
    %1 = arith.extui %0 : i1 to i32
    %c0_i32_0 = arith.constant 0 : i32
    %2 = arith.cmpi ne, %1, %c0_i32_0 : i32
    scf.if %2 {
      %cst_9 = arith.constant 0.000000e+00 : f32
      %12 = vector.broadcast %cst_9 : f32 to vector<2x32xf32>
      %c0_10 = arith.constant 0 : index
      %c0_11 = arith.constant 0 : index
      %13 = vector.load %arg5[%c0_10, %c0_11] : memref<2x32xf32, #tpu.memory_space<vmem>>, vector<2x32xf32>
      tpu.vector_store %arg5[%c0_10, %c0_11], %12 {strides = array<i32>} : memref<2x32xf32, #tpu.memory_space<vmem>>, vector<2x32xf32>,
    } else {
    }
    %c0 = arith.constant 0 : index
    %c0_1 = arith.constant 0 : index
    %3 = vector.load %arg5[%c0, %c0_1] : memref<2x32xf32, #tpu.memory_space<vmem>>, vector<2x32xf32>
    %c0_2 = arith.constant 0 : index
    %c0_3 = arith.constant 0 : index
    %c0_4 = arith.constant 0 : index
    %4 = vector.load %arg1[%c0_2, %c0_3, %c0_4] : memref<2x8x32xbf16, #tpu.memory_space<vmem>>, vector<2x8x32xbf16>
    %5 = arith.extf %4 : vector<2x8x32xbf16> to vector<2x8x32xf32>
    %cst = arith.constant dense<0.000000e+00> : vector<2x32xf32>
    %6 = vector.multi_reduction <add>, %5, %cst [1] : vector<2x8x32xf32> to vector<2x32xf32>
    %7 = arith.addf %3, %6 : vector<2x32xf32>
    %c0_5 = arith.constant 0 : index
    %c0_6 = arith.constant 0 : index
    %8 = vector.load %arg5[%c0_5, %c0_6] : memref<2x32xf32, #tpu.memory_space<vmem>>, vector<2x32xf32>
    tpu.vector_store %arg5[%c0_5, %c0_6], %7 {strides = array<i32>} : memref<2x32xf32, #tpu.memory_space<vmem>>, vector<2x32xf32>,
    %c0_i32_7 = arith.constant 0 : i32
    %9 = arith.cmpi eq, %arg0, %c0_i32_7 : i32
    %10 = arith.extui %9 : i1 to i32
    %c0_i32_8 = arith.constant 0 : i32
    %11 = arith.cmpi ne, %10, %c0_i32_8 : i32
    scf.if %11 {
      %c0_9 = arith.constant 0 : index
      %c0_10 = arith.constant 0 : index
      %12 = vector.load %arg5[%c0_9, %c0_10] : memref<2x32xf32, #tpu.memory_space<vmem>>, vector<2x32xf32>
      %cst_11 = arith.constant 1.250000e-01 : f32
      %13 = vector.broadcast %cst_11 : f32 to vector<2x32xf32>
      %14 = arith.mulf %12, %13 : vector<2x32xf32>
      %c0_12 = arith.constant 0 : index
      %c0_13 = arith.constant 0 : index
      %15 = vector.load %arg2[%c0_12, %c0_13] : memref<32x3xf32, #tpu.memory_space<vmem>>, vector<32x3xf32>
      %cst_14 = arith.constant dense<0.000000e+00> : vector<2x3xf32>
      %16 = tpu.matmul %14, %15, %cst_14 {dimension_numbers = #tpu.dot_dimension_numbers<[1], [0], [0], [1], [0, 0, 1, 1], [], []>} : vector<2x32xf32>, vector<32x3xf32>, vector<2x3xf32> -> vector<2x3xf32>
      %c0_15 = arith.constant 0 : index
      %c0_16 = arith.constant 0 : index
      %17 = vector.load %arg3[%c0_15, %c0_16] : memref<1x3xf32, #tpu.memory_space<vmem>>, vector<1x3xf32>
      %18 = vector.broadcast %17 : vector<1x3xf32> to vector<2x3xf32>
      %19 = arith.addf %16, %18 : vector<2x3xf32>
      %c0_17 = arith.constant 0 : index
      %c0_18 = arith.constant 0 : index
      %20 = vector.load %arg4[%c0_17, %c0_18] : memref<2x3xf32, #tpu.memory_space<vmem>>, vector<2x3xf32>
      tpu.vector_store %arg4[%c0_17, %c0_18], %19 {strides = array<i32>} : memref<2x3xf32, #tpu.memory_space<vmem>>, vector<2x3xf32>,
    } else {
    }
    return
  }
  func.func @transform_0(%arg0: i32) -> (i32, i32, i32) {
    %c0_i32 = arith.constant 0 : i32
    %c0_i32_0 = arith.constant 0 : i32
    %c0_i32_1 = arith.constant 0 : i32
    return %c0_i32, %arg0, %c0_i32_0 : i32, i32, i32
  }
  func.func @transform_1(%arg0: i32) -> (i32, i32) {
    %c0_i32 = arith.constant 0 : i32
    %c0_i32_0 = arith.constant 0 : i32
    %c0_i32_1 = arith.constant 0 : i32
    return %c0_i32, %c0_i32_0 : i32, i32
  }
  func.func @transform_2(%arg0: i32) -> (i32, i32) {
    %c0_i32 = arith.constant 0 : i32
    %c0_i32_0 = arith.constant 0 : i32
    %c0_i32_1 = arith.constant 0 : i32
    return %c0_i32, %c0_i32_0 : i32, i32
  }
  func.func @transform_3(%arg0: i32) -> (i32, i32) {
    %c0_i32 = arith.constant 0 : i32
    %c0_i32_0 = arith.constant 0 : i32
    %c0_i32_1 = arith.constant 0 : i32
    return %c0_i32, %c0_i32_0 : i32, i32
  }
}

</mosaic_0001>

<bundles_post_ra>
// kernel: _lambda_.14
= control target key start
LH: loop header
LB: loop body
LE: loop exit
PB: predicated region body
PF: predicated region fallthrough
CT: control target
= control target key end

     0   :  { %vm19_vm0 = vcmask 261120   ;;  %v171_v0 = vmov 0.0   ;;  %vm172_vm1 = vmmov 0   ;;  %vm59_vm2 = vcmask 523264   ;;  %s224_s1 = inlined_call_operand.vmem [shape: bf16[64,32], index: 1, kind: input, shape index: {}]   ;;  %s225_s0 = inlined_call_operand.vmem [shape: f32[16,64], index: 0, kind: input, shape index: {}]   ;;  %s226_s2 = inlined_call_operand.vmem [shape: f32[1,32], index: 2, kind: input, shape index: {}]   ;;  %s227_s3 = inlined_call_operand.vmem [shape: bf16[16,32], index: 3, kind: output, shape index: {}]  }
   0x1   :  { %153 = vmatprep.subr.bf16.mxu0 %v171_v0  ;;  %v167_v1 = vld [vmem:[%s224_s1] sm:$0xff]   ;;  %161 = vmatprep.mubr.msk.bf16.mxu0 %vm172_vm1, %v171_v0  ;;  %20 = vst.msk [vmem:[#allocation2] sm:$0xff] %vm19_vm0, %v171_v0  ;;  %21 = vst.msk [vmem:[#allocation2 + $0x8] sm:$0xff] %vm19_vm0, %v171_v0  ;;  %v168_v2 = vld [vmem:[%s224_s1 + $0x8] sm:$0xff]   ;;  %vm131_vm3 = vcmask 257024  }
   0x2   :  { %154 = vmatpush3.bf16.msra.mxu0 %v167_v1  ;;  %v169_v3 = vld [vmem:[%s224_s1 + $0x10] sm:$0xff]   ;;  %v170_v4 = vld [vmem:[%s224_s1 + $0x18] sm:$0xff]   ;;  %v24_v5 = vld [vmem:[%s225_s0] sm:$0xff] }
   0x3   :  { %155 = vmatprep.subr.bf16.mxu0 %v171_v0  ;;  %v25_v6 = vld [vmem:[%s225_s0 + $0x8] sm:$0xff]  ;;  %v143_v16 = vld [vmem:[%s226_s2] ss:$0 sm:$0xff] }
   0x4   :  { %v26_v7 = vpack.c.bf16 %v25_v6, %v24_v5 }
   0x6   :  { %156 = vmatpush3.bf16.msra.mxu0 %v168_v2 }
   0x7   :  { %157 = vmatprep.subr.bf16.mxu0 %v171_v0 }
   0x8   :  { %v22_v8 = vld [vmem:[#allocation2] sm:$0xff]  ;;  %v23_v10 = vld [vmem:[#allocation2 + $0x8] sm:$0xff] }
   0xa   :  { %158 = vmatpush3.bf16.msra.mxu0 %v169_v3 }
   0xb   :  { %159 = vmatprep.subr.bf16.mxu0 %v171_v0 }
   0xe   :  { %160 = vmatpush3.bf16.msra.mxu0 %v170_v4 }
  0x11   :  { %162 = vmatmul.mubr.msk.bf16.vlgmr.msra.gmra.mrb[0].mxu0 %vm59_vm2, %v26_v7 }
  0xe4   :  { %v97_v9 = vpop.f32.mrb[0].mxu0 }
  0xe5   :  { %v104_v11 = vadd.f32 %v97_v9, %v22_v8  ;;  %v163_v12 = vpop.f32.mrb[1].mxu0 }
  0xe6   :  { %v100_v13 = vpop.f32.mrb[2].mxu0 }
  0xe7   :  { %107 = vst.msk [vmem:[#allocation2] sm:$0xff] %vm19_vm0, %v104_v11  ;;  %v105_v14 = vadd.f32 %v100_v13, %v23_v10  ;;  %v164_v15 = vpop.f32.mrb[3].mxu0 }
  0xe9   :  { %108 = vst.msk [vmem:[#allocation2 + $0x8] sm:$0xff] %vm19_vm0, %v105_v14 }
  0xee   :  { %v112_v17 = vld [vmem:[#allocation2] sm:$0xff] }
  0xef   :  { %v121_v18 = vadd.f32 %v143_v16, %v112_v17 }
  0xf0   :  { %v113_v19 = vld [vmem:[#allocation2 + $0x8] sm:$0xff] }
  0xf1   :  { %v146_v20 = vpack.c.bf16 %v121_v18, %v121_v18  ;;  %v122_v21 = vadd.f32 %v143_v16, %v113_v19 }
  0xf3   :  { %132 = vst.msk [vmem:[%s227_s3] sm:$0xf] %vm131_vm3, %v146_v20  ;;  %v147_v22 = vpack.c.bf16 %v122_v21, %v122_v21 }
  0xf5   :  { %133 = vst.msk [vmem:[%s227_s3 + $0x4] sm:$0xf] %vm131_vm3, %v147_v22 }

// kernel: _lambda_.15
= control target key start
LH: loop header
LB: loop body
LE: loop exit
PB: predicated region body
PF: predicated region fallthrough
CT: control target
= control target key end

     0   :  { %vm19_vm0 = vcmask 261120   ;;  %v150_v0 = vmov 0.0   ;;  %vm151_vm1 = vmmov 0   ;;  %vm118_vm2 = vcmask 257024   ;;  %s195_s1 = inlined_call_operand.vmem [shape: bf16[32,32], index: 1, kind: input, shape index: {}]   ;;  %s196_s0 = inlined_call_operand.vmem [shape: bf16[16,32], index: 0, kind: input, shape index: {}]   ;;  %s197_s2 = inlined_call_operand.vmem [shape: f32[1,32], index: 2, kind: input, shape index: {}]   ;;  %s198_s3 = inlined_call_operand.vmem [shape: bf16[16,32], index: 3, kind: output, shape index: {}]  }
   0x1   :  { %137 = vmatprep.subr.bf16.mxu0 %v150_v0  ;;  %v147_v1 = vld [vmem:[%s195_s1] sm:$0xff]   ;;  %141 = vmatprep.mubr.msk.bf16.mxu0 %vm151_vm1, %v150_v0  ;;  %20 = vst.msk [vmem:[#allocation2] sm:$0xff] %vm19_vm0, %v150_v0  ;;  %21 = vst.msk [vmem:[#allocation2 + $0x8] sm:$0xff] %vm19_vm0, %v150_v0  ;;  %v148_v2 = vld [vmem:[%s195_s1 + $0x8] sm:$0xff]  }
   0x2   :  { %138 = vmatpush3.bf16.msra.mxu0 %v147_v1  ;;  %v149_v3 = vld [vmem:[%s196_s0] sm:$0xff]  }
   0x3   :  { %139 = vmatprep.subr.bf16.mxu0 %v150_v0  ;;  %v129_v12 = vld [vmem:[%s197_s2] ss:$0 sm:$0xff] }
   0x6   :  { %140 = vmatpush3.bf16.msra.mxu0 %v148_v2 }
   0x8   :  { %v22_v4 = vld [vmem:[#allocation2] sm:$0xff]  ;;  %v23_v6 = vld [vmem:[#allocation2 + $0x8] sm:$0xff] }
   0x9   :  { %142 = vmatmul.mubr.msk.bf16.vlgmr.msra.gmra.mrb[0].mxu0 %vm19_vm0, %v149_v3 }
  0xdc   :  { %v85_v5 = vpop.f32.mrb[0].mxu0 }
  0xdd   :  { %v92_v7 = vadd.f32 %v85_v5, %v22_v4  ;;  %v143_v8 = vpop.f32.mrb[1].mxu0 }
  0xde   :  { %v88_v9 = vpop.f32.mrb[2].mxu0 }
  0xdf   :  { %94 = vst.msk [vmem:[#allocation2] sm:$0xff] %vm19_vm0, %v92_v7  ;;  %v93_v10 = vadd.f32 %v88_v9, %v23_v6  ;;  %v144_v11 = vpop.f32.mrb[3].mxu0 }
  0xe1   :  { %95 = vst.msk [vmem:[#allocation2 + $0x8] sm:$0xff] %vm19_vm0, %v93_v10 }
  0xe6   :  { %v99_v13 = vld [vmem:[#allocation2] sm:$0xff] }
  0xe7   :  { %v108_v14 = vadd.f32 %v129_v12, %v99_v13 }
  0xe8   :  { %v100_v15 = vld [vmem:[#allocation2 + $0x8] sm:$0xff] }
  0xe9   :  { %v132_v16 = vpack.c.bf16 %v108_v14, %v108_v14  ;;  %v109_v17 = vadd.f32 %v129_v12, %v100_v15 }
  0xeb   :  { %119 = vst.msk [vmem:[%s198_s3] sm:$0xf] %vm118_vm2, %v132_v16  ;;  %v133_v18 = vpack.c.bf16 %v109_v17, %v109_v17 }
  0xed   :  { %120 = vst.msk [vmem:[%s198_s3 + $0x4] sm:$0xf] %vm118_vm2, %v133_v18 }

// kernel: _lambda_.19
= control target key start
LH: loop header
LB: loop body
LE: loop exit
PB: predicated region body
PF: predicated region fallthrough
CT: control target
= control target key end

     0   :  { %vm28_vm0 = vcmask 261120   ;;  %v220_v0 = vmov 0.0   ;;  %vm221_vm1 = vmmov 0   ;;  %vm178_vm2 = vcmask 257024   ;;  %s293_s1 = inlined_call_operand.vmem [shape: bf16[32,32], index: 1, kind: input, shape index: {}]   ;;  %s294_s0 = inlined_call_operand.vmem [shape: bf16[16,32], index: 0, kind: input, shape index: {}]   ;;  %s295_s3 = inlined_call_operand.vmem [shape: bf16[16,32], index: 3, kind: input, shape index: {}]   ;;  %s296_s2 = inlined_call_operand.vmem [shape: f32[1,32], index: 2, kind: input, shape index: {}, may-alias: {2,5}]   ;;  %s297_s4 = inlined_call_operand.vmem [shape: f32[1,32], index: 4, kind: input, shape index: {}]   ;;  %s298_s5 = inlined_call_operand.vmem [shape: f32[1,32], index: 5, kind: input, shape index: {}, may-alias: {2,5}]   ;;  %s299_s6 = inlined_call_operand.vmem [shape: bf16[16,32], index: 6, kind: output, shape index: {}]  }
   0x1   :  { %203 = vmatprep.subr.bf16.mxu0 %v220_v0  ;;  %v213_v1 = vld [vmem:[%s293_s1] sm:$0xff]   ;;  %207 = vmatprep.mubr.msk.bf16.mxu0 %vm221_vm1, %v220_v0  ;;  %29 = vst.msk [vmem:[#allocation2] sm:$0xff] %vm28_vm0, %v220_v0  ;;  %30 = vst.msk [vmem:[#allocation2 + $0x8] sm:$0xff] %vm28_vm0, %v220_v0  ;;  %v214_v2 = vld [vmem:[%s293_s1 + $0x8] sm:$0xff]  }
   0x2   :  { %204 = vmatpush3.bf16.msra.mxu0 %v213_v1  ;;  %v215_v3 = vld [vmem:[%s294_s0] sm:$0xff]  }
   0x3   :  { %205 = vmatprep.subr.bf16.mxu0 %v220_v0  ;;  %v197_v12 = vld [vmem:[%s295_s3] sm:$0xff]  }
   0x4   :  { %v189_v13 = vld [vmem:[%s296_s2] ss:$0 sm:$0xff]  ;;  %v198_v14 = vunpack.c.l.bf16 %v197_v12  ;;  %v199_v17 = vunpack.c.h.bf16 %v197_v12 }
   0x5   :  { %v190_v41 = vld [vmem:[%s297_s4] ss:$0 sm:$0xff] }
   0x6   :  { %206 = vmatpush3.bf16.msra.mxu0 %v214_v2  ;;  %v191_v43 = vld [vmem:[%s298_s5] ss:$0 sm:$0xff] }
   0x8   :  { %v31_v4 = vld [vmem:[#allocation2] sm:$0xff]  ;;  %v32_v6 = vld [vmem:[#allocation2 + $0x8] sm:$0xff] }
   0x9   :  { %208 = vmatmul.mubr.msk.bf16.vlgmr.msra.gmra.mrb[0].mxu0 %vm28_vm0, %v215_v3 }
  0xdc   :  { %v94_v5 = vpop.f32.mrb[0].mxu0 }
  0xdd   :  { %v101_v7 = vadd.f32 %v94_v5, %v31_v4  ;;  %v209_v8 = vpop.f32.mrb[1].mxu0 }
  0xde   :  { %v97_v9 = vpop.f32.mrb[2].mxu0 }
  0xdf   :  { %103 = vst.msk [vmem:[#allocation2] sm:$0xff] %vm28_vm0, %v101_v7  ;;  %v102_v10 = vadd.f32 %v97_v9, %v32_v6  ;;  %v210_v11 = vpop.f32.mrb[3].mxu0 }
  0xe1   :  { %104 = vst.msk [vmem:[#allocation2 + $0x8] sm:$0xff] %vm28_vm0, %v102_v10 }
  0xe6   :  { %v108_v15 = vld [vmem:[#allocation2] sm:$0xff] }
  0xe7   :  { %v117_v16 = vadd.f32 %v189_v13, %v108_v15 }
  0xe8   :  { %v109_v18 = vld [vmem:[#allocation2 + $0x8] sm:$0xff] }
  0xe9   :  { %v123_v19 = vadd.f32 %v198_v14, %v117_v16  ;;  %v118_v20 = vadd.f32 %v189_v13, %v109_v18 }
  0xeb   :  { %v125_v21 = vsel %vm28_vm0, %v123_v19, 0.0  ;;  %v124_v22 = vadd.f32 %v199_v17, %v118_v20 }
  0xec   :  { %126 = vadd.xlane.f32.xlu0 %v125_v21 }
  0xed   :  { %v128_v23 = vsel %vm28_vm0, %v124_v22, 0.0 }
  0xf0   :  { %129 = vadd.xlane.f32.xlu0 %v128_v23 }
 0x179   :  { %v127_v24 = vpop.xlane.xlu0 %126 }
 0x17a   :  { %v132_v25 = vmul.f32 0.03125, %v127_v24 }
 0x17c   :  { %v134_v26 = vsub.f32 %v123_v19, %v132_v25 }
 0x17d   :  { %v130_v27 = vpop.xlane.xlu0 %129 }
 0x17e   :  { %v133_v28 = vmul.f32 0.03125, %v130_v27  ;;  %v136_v29 = vmul.f32 %v134_v26, %v134_v26 }
 0x180   :  { %v135_v30 = vsub.f32 %v124_v22, %v133_v28  ;;  %v138_v31 = vsel %vm28_vm0, %v136_v29, 0.0 }
 0x181   :  { %139 = vadd.xlane.f32.xlu1 %v138_v31 }
 0x182   :  { %v137_v32 = vmul.f32 %v135_v30, %v135_v30 }
 0x184   :  { %v141_v33 = vsel %vm28_vm0, %v137_v32, 0.0 }
 0x185   :  { %142 = vadd.xlane.f32.xlu1 %v141_v33 }
 0x20e   :  { %v140_v34 = vpop.xlane.xlu1 %139 }
 0x20f   :  { %v144_v35 = vmul.f32 0.03125, %v140_v34 }
 0x211   :  { %v146_v36 = vadd.f32 1e-05, %v144_v35 }
 0x212   :  { %v143_v37 = vpop.xlane.xlu1 %142 }
 0x213   :  { %216 = vrsqrt.f32 %v146_v36  ;;  %v145_v38 = vmul.f32 0.03125, %v143_v37 }
 0x215   :  { %v147_v39 = vadd.f32 1e-05, %v145_v38 }
 0x217   :  { %218 = vrsqrt.f32 %v147_v39 }
 0x21d   :  { %v217_v40 = vpop.eup %216 }
 0x21e   :  { %v150_v42 = vmul.f32 %v217_v40, %v134_v26 }
 0x220   :  { %v159_v44 = vmul.f32 %v190_v41, %v150_v42 }
 0x221   :  { %v219_v45 = vpop.eup %218 }
 0x222   :  { %v168_v46 = vadd.f32 %v191_v43, %v159_v44  ;;  %v151_v47 = vmul.f32 %v219_v45, %v135_v30 }
 0x224   :  { %v194_v48 = vpack.c.bf16 %v168_v46, %v168_v46  ;;  %v160_v49 = vmul.f32 %v190_v41, %v151_v47 }
 0x226   :  { %179 = vst.msk [vmem:[%s299_s6] sm:$0xf] %vm178_vm2, %v194_v48  ;;  %v169_v50 = vadd.f32 %v191_v43, %v160_v49 }
 0x228   :  { %v195_v51 = vpack.c.bf16 %v169_v50, %v169_v50 }
 0x22a   :  { %180 = vst.msk [vmem:[%s299_s6 + $0x4] sm:$0xf] %vm178_vm2, %v195_v51 }

// kernel: _lambda_.18
= control target key start
LH: loop header
LB: loop body
LE: loop exit
PB: predicated region body
PF: predicated region fallthrough
CT: control target
= control target key end

     0   :  { %s1171_s12 = smov 0   ;;  %s1173_s13 = smov 0   ;;  %s1343_s0 = inlined_call_operand.vmem [shape: bf16[2,8,32], index: 0, kind: input, shape index: {}]   ;;  %s1344_s1 = inlined_call_operand.vmem [shape: bf16[2,8,32], index: 1, kind: input, shape index: {}]   ;;  %s1345_s2 = inlined_call_operand.vmem [shape: bf16[2,8,32], index: 2, kind: input, shape index: {}]   ;;  %s1346_s3 = inlined_call_operand.vmem [shape: bf16[2,8,32], index: 3, kind: output, shape index: {}]  }
   0x1   :  { %s1175_s14 = smov 0  }
   0x2 LB: > { %s32_s15 = sadd.s32 1, %s1132_s13  ;;  %p962_p0 = scmp.ge.s32.totalorder %s1136_s14, 1  ;;  %s1136_s14 = sphi %s1175_s14, %s13_s14   ;;  %s1132_s13 = sphi %s1173_s13, %s1348_s13   ;;  %s1128_s12 = sphi %s1171_s12, %s1347_s12  }
   0x3   : > { %p34_p1 = scmp.ge.s32.totalorder %s32_s15, 2  ;;  %p190_p2 = scmp.lt.s32.totalorder %s1136_s14, 3 }
   0x5   : > { %s1350_s15 = smov (%p34_p1, %s32_s15), 0  ;;  %p191_p3 = pnand %p962_p0, %p190_p2 }
   0x6   : > { %p232_p4 = scmp.lt.s32.totalorder (!%p191_p3), %s1128_s12, 1  ;;  %v1138_v0 = vmov (!%p191_p3), 0.0   ;;  %vm1139_vm0 = vmmov (!%p191_p3), 0   ;;  %vm278_vm1 = vcmask (!%p191_p3), 64512   ;;  %vm266_vm2 = vcmask (!%p191_p3), 31744   ;;  %s1142_s23 = smov (!%p191_p3), 120  }
   0x7   : > { %194 = sbr.rel (%p191_p3) target bundleno = 1416 (0x588), region = 32  ;;  %996 = vmatprep.subr.bf16.mxu0 (!%p191_p3), %v1138_v0  ;;  %998 = vmatprep.mubr.msk.bf16.mxu0 (!%p191_p3), %vm1139_vm0, %v1138_v0  ;;  %v1140_v5 = vmov (!%p191_p3), -inf   ;;  %268 = vst.msk [vmem:[#allocation3] sm:$0xff] (!%p191_p3), %vm266_vm2, %v1138_v0  ;;  %v1141_v11 = vmov (!%p191_p3), 0   ;;  %s1143_s24 = smov (!%p191_p3), 112   ;;  %vm349_vm3 = vcmask (!%p191_p3), 1043456  }
   0x8   : > { %1002 = vmatprep.subr.bf16.mxu1 (!%p191_p3), %v1138_v0  ;;  %1004 = vmatprep.mubr.msk.bf16.mxu1 (!%p191_p3), %vm1139_vm0, %v1138_v0  ;;  %267 = vst.msk [vmem:[#allocation2] sm:$0xff] (!%p191_p3), %vm266_vm2, %v1140_v5  ;;  %s1144_s25 = smov (!%p191_p3), 104   ;;  %v1145_v50 = vmov (!%p191_p3), 1   ;;  %v1146_v53 = vmov (!%p191_p3), 2   ;;  %v1147_v58 = vmov (!%p191_p3), 3   ;;  %vm269_vm4 = vcmask (!%p191_p3), 261120  }
   0x9   : > { %1081 = vset.pattern.permute.xlu0 (!%p191_p3), %v1141_v11  ;;  %1082 = vset.pattern.permute.xlu1 (!%p191_p3), %v1145_v50  ;;  %270 = vst.msk [vmem:[#allocation4] sm:$0xff] (!%p191_p3), %vm269_vm4, %v1138_v0  ;;  %vm799_vm5 = vcmask (!%p191_p3), 7168   ;;  %vm801_vm6 = vcmask (!%p191_p3), 15360   ;;  %vm803_vm7 = vcmask (!%p191_p3), 23552   ;;  %s1148_s29 = smov (!%p191_p3), 8   ;;  %s1149_s30 = smov (!%p191_p3), 16  }
   0xa   : > { %s1150_s4 = smov (!%p191_p3), 24   ;;  %vm812_vm8 = vcmask (!%p191_p3), 130048   ;;  %vm814_vm9 = vcmask (!%p191_p3), 195584   ;;  %vm849_vm10 = vcmask (!%p191_p3), 257024  }
   0xe   : > { %s1352_s12 = smov (!%p232_p4, %s1128_s12), 1 }
   0xf   : > { %s1195_s16 = sshll.u32 %s1352_s12, 2  ;;  %v1221_v14 = vld [vmem:[#allocation2] sm:$0xff] }
  0x10   : > { %s245_s19 = scalar_lea.vmem %s1344_s1, %s1195_s16  ;;  %s238_s22 = scalar_lea.vmem %s1343_s0, %s1195_s16 }
  0x11   : > { %v272_v1 = vld [vmem:[%s245_s19] sm:$0xf]  ;;  %s252_s28 = scalar_lea.vmem %s1345_s2, %s1195_s16  ;;  %s259_s7 = scalar_lea.vmem %s1346_s3, %s1195_s16 }
  0x12   : > { %v283_v2 = vsel %vm278_vm1, %v272_v1, 0  ;;  %v271_v3 = vld [vmem:[%s238_s22] sm:$0xf]  ;;  %v970_v12 = vcombine.low %v272_v1, %v272_v1 }
  0x13   : > { %997 = vmatpush3.bf16.xpose.msra.mxu0 %v283_v2  ;;  %v277_v4 = vmul.bf16 1052065461, %v271_v3  ;;  %v1231_v17 = vld [vmem:[%s252_s28] sm:$0xf] }
  0x14   : > { %1014 = vmatprep.subr.bf16.mxu0 %v1138_v0  ;;  %408 = vrot.lane.b32.xlu1 %v970_v12, %s1142_s23  ;;  %v351_v18 = vsel %vm349_vm3, %v1231_v17, 0  ;;  %v972_v3 = vcombine.low %v1231_v17, %v1231_v17 }
  0x15   : > { %v969_v13 = vcombine.low %v277_v4, %v277_v4  ;;  %1003 = vmatpush3.bf16.msra.mxu1 %v351_v18 }
  0x16   : > { %1008 = vmatprep.subr.bf16.mxu1 %v1138_v0 }
  0x18   : > { %403 = vrot.lane.b32.xlu1 %v969_v13, %s1142_s23 }
  0x1a   : > { %999 = vmatmul.mubr.msk.bf16.vlgmr.msra.gmra.mrb[0].mxu0 %vm278_vm1, %v277_v4 }
  0x1b   : > { %1016 = vmatprep.mubr.msk.bf16.mxu0 %vm1139_vm0, %v1138_v0 }
  0x1c   : > { %541 = vrot.lane.b32.xlu1 %v970_v12, %s1143_s24 }
  0x20   : > { %539 = vrot.lane.b32.xlu1 %v969_v13, %s1143_s24 }
  0x24   : > { %671 = vrot.lane.b32.xlu1 %v970_v12, %s1144_s25 }
  0x28   : > { %669 = vrot.lane.b32.xlu1 %v969_v13, %s1144_s25 }
  0x86   : > { %v409_v22 = vpop.permute.xlu1 %408 }
  0x87   : > { %v414_v25 = vsel %vm278_vm1, %v409_v22, 0 }
  0x8a   : > { %v404_v23 = vpop.permute.xlu1 %403 }
  0x8e   : > { %v542_v27 = vpop.permute.xlu1 %541 }
  0x8f   : > { %v547_v29 = vsel %vm278_vm1, %v542_v27, 0 }
  0x92   : > { %v540_v28 = vpop.permute.xlu1 %539 }
  0x96   : > { %v672_v30 = vpop.permute.xlu1 %671 }
  0x97   : > { %v677_v31 = vsel %vm278_vm1, %v672_v30, 0 }
  0x9a   : > { %v670_v32 = vpop.permute.xlu1 %669 }
  0xed   : > { %v319_v6 = vpop.f32.mrb[0].mxu0 }
  0xee   : > { %v1000_v7 = vpop.f32.mrb[1].mxu0  ;;  %v325_v8 = vsel %vm278_vm1, %v319_v6, -inf }
  0xef   : > { %326 = vmax.xlane.f32.xlu0 %v325_v8  ;;  %v322_v9 = vpop.f32.mrb[2].mxu0 }
  0xf0   : > { %v1001_v10 = vpop.f32.mrb[3].mxu0 }
 0x17c   : > { %v327_v15 = vpop.xlane.xlu0 %326 }
 0x17d   : > { %v1224_v16 = vmax.f32 %v1221_v14, %v327_v15 }
 0x17f   : > { %334 = vperm.xlu0 %1081, %v1224_v16   ;;  %v329_v54 = vsub.f32 %v1221_v14, %v1224_v16 }
 0x181   : > { %v330_v56 = vmul.f32 1.442695, %v329_v54 }
 0x183   : > { %1083 = vset.pattern.permute.xlu0 %v1146_v53 }
 0x1fe   : > { %v335_v19 = vpop.permute.xlu0 %334 }
 0x1ff   : > { %v337_v20 = vsub.f32 %v319_v6, %v335_v19 }
 0x201   : > { %v338_v21 = vmul.f32 1.442695, %v337_v20 }
 0x203   : > { %1096 = vpow2.f32 %v338_v21 }
 0x204   : > { %1098 = vpow2.f32 %v330_v56 }
 0x20d   : > { %v1236_v24 = vpop.eup %1096 }
 0x20e   : > { %v345_v26 = vpack.c.bf16 %v1236_v24, %v1236_v24  ;;  %v1272_v61 = vpop.eup %1098  ;;  %v341_v5 = vsel %vm278_vm1, %v1236_v24, 0.0 }
 0x210   : > { %1005 = vmatmul.mubr.msk.bf16.vlgmr.msra.gmra.mrb[0].mxu1 %vm278_vm1, %v345_v26 }
 0x211   : > { %1009 = vmatpush3.bf16.xpose.msra.mxu1 %v414_v25  ;;  %1010 = vmatprep.mubr.msk.bf16.mxu1 %vm1139_vm0, %v1138_v0 }
 0x212   : > { %1020 = vmatprep.subr.bf16.mxu1 %v1138_v0 }
 0x218   : > { %1011 = vmatmul.mubr.msk.bf16.vlgmr.msra.gmra.mrb[4].mxu1 %vm278_vm1, %v404_v23 }
 0x219   : > { %1021 = vmatpush3.bf16.xpose.msra.mxu1 %v547_v29  ;;  %1022 = vmatprep.mubr.msk.bf16.mxu1 %vm1139_vm0, %v1138_v0 }
 0x21a   : > { %1032 = vmatprep.subr.bf16.mxu1 %v1138_v0 }
 0x220   : > { %1023 = vmatmul.mubr.msk.bf16.vlgmr.msra.gmra.mrb[8].mxu1 %vm278_vm1, %v540_v28 }
 0x221   : > { %1033 = vmatpush3.bf16.xpose.msra.mxu1 %v677_v31  ;;  %1034 = vmatprep.mubr.msk.bf16.mxu1 %vm1139_vm0, %v1138_v0 }
 0x228   : > { %1035 = vmatmul.mubr.msk.bf16.vlgmr.msra.gmra.mrb[12].mxu1 %vm278_vm1, %v670_v32 }
 0x2e3   : > { %v1255_v33 = vpop.f32.mrb[0].mxu1 }
 0x2e4   : > { %v1006_v34 = vpop.f32.mrb[1].mxu1 }
 0x2e5   : > { %v390_v35 = vpop.f32.mrb[2].mxu1 }
 0x2e6   : > { %v1007_v36 = vpop.f32.mrb[3].mxu1 }
 0x2eb   : > { %v450_v37 = vpop.f32.mrb[4].mxu1 }
 0x2ec   : > { %v1012_v38 = vpop.f32.mrb[5].mxu1  ;;  %v456_v39 = vsel %vm278_vm1, %v450_v37, -inf }
 0x2ed   : > { %457 = vmax.xlane.f32.xlu1 %v456_v39  ;;  %v453_v40 = vpop.f32.mrb[6].mxu1 }
 0x2ee   : > { %v1013_v41 = vpop.f32.mrb[7].mxu1 }
 0x2f3   : > { %v583_v42 = vpop.f32.mrb[8].mxu1 }
 0x2f4   : > { %v1024_v43 = vpop.f32.mrb[9].mxu1  ;;  %v589_v44 = vsel %vm278_vm1, %v583_v42, -inf }
 0x2f5   : > { %590 = vmax.xlane.f32.xlu0 %v589_v44  ;;  %v586_v45 = vpop.f32.mrb[10].mxu1 }
 0x2f6   : > { %v1025_v46 = vpop.f32.mrb[11].mxu1 }
 0x2fb   : > { %v713_v47 = vpop.f32.mrb[12].mxu1 }
 0x2fc   : > { %v1036_v48 = vpop.f32.mrb[13].mxu1  ;;  %v719_v49 = vsel %vm278_vm1, %v713_v47, -inf }
 0x2fd   : > { %720 = vmax.xlane.f32.xlu1 %v719_v49  ;;  %v716_v51 = vpop.f32.mrb[14].mxu1 }
 0x2fe   : > { %v1037_v52 = vpop.f32.mrb[15].mxu1 }
 0x37a   : > { %v458_v55 = vpop.xlane.xlu1 %457 }
 0x37b   : > { %v1265_v57 = vmax.f32 %v1221_v14, %v458_v55 }
 0x37d   : > { %465 = vperm.xlu1 %1082, %v1265_v57   ;;  %v800_v63 = vsel %vm799_vm5, %v1224_v16, %v1265_v57  ;;  %v460_v30 = vsub.f32 %v1221_v14, %v1265_v57 }
 0x37f   : > { %v461_v35 = vmul.f32 1.442695, %v460_v30 }
 0x381   : > { %1084 = vset.pattern.permute.xlu1 %v1147_v58 }
 0x382   : > { %v591_v59 = vpop.xlane.xlu0 %590 }
 0x383   : > { %v592_v60 = vmax.f32 %v1221_v14, %v591_v59 }
 0x385   : > { %598 = vperm.xlu0 %1083, %v592_v60   ;;  %v802_v2 = vsel %vm801_vm6, %v800_v63, %v592_v60  ;;  %v593_v19 = vsub.f32 %v1221_v14, %v592_v60 }
 0x387   : > { %v594_v24 = vmul.f32 1.442695, %v593_v19 }
 0x389   : > { %1085 = vset.pattern.permute.xlu0 %v1141_v11 }
 0x38a   : > { %v721_v62 = vpop.xlane.xlu1 %720  ;;  %395 = vperm.xlu0 %1085, %v1272_v61  }
 0x38b   : > { %v722_v1 = vmax.f32 %v1221_v14, %v721_v62 }
 0x38d   : > { %v804_v4 = vsel %vm803_vm7, %v802_v2, %v722_v1  ;;  %728 = vperm.xlu1 %1084, %v722_v1   ;;  %v723_v36 = vsub.f32 %v1221_v14, %v722_v1 }
 0x38e   : > { %806 = vst.msk [vmem:[#allocation2] sm:$0xff] %vm266_vm2, %v804_v4  ;;  %1087 = vset.pattern.permute.xlu0 %v1146_v53 }
 0x38f   : > { %v724_v39 = vmul.f32 1.442695, %v723_v36 }
 0x391   : > { %480 = vrot.lane.b32.xlu1 %v972_v3, %s1142_s23 }
 0x392   : > { %1086 = vset.pattern.permute.xlu1 %v1145_v50 }
 0x395   : > { %610 = vrot.lane.b32.xlu1 %v972_v3, %s1143_s24 }
 0x399   : > { %740 = vrot.lane.b32.xlu1 %v972_v3, %s1144_s25 }
 0x3bd   : > { %342 = vadd.xlane.f32.xlu1 %v341_v5 }
 0x3fc   : > { %v466_v6 = vpop.permute.xlu1 %465 }
 0x3fd   : > { %v468_v7 = vsub.f32 %v450_v37, %v466_v6 }
 0x3ff   : > { %v469_v8 = vmul.f32 1.442695, %v468_v7 }
 0x401   : > { %1100 = vpow2.f32 %v469_v8 }
 0x404   : > { %v599_v9 = vpop.permute.xlu0 %598 }
 0x405   : > { %v601_v10 = vsub.f32 %v583_v42, %v599_v9  ;;  %v275_v42 = vld [vmem:[#allocation3] sm:$0xff] }
 0x407   : > { %v602_v12 = vmul.f32 1.442695, %v601_v10 }
 0x409   : > { %1102 = vpow2.f32 %v602_v12 }
 0x40b   : > { %v1101_v13 = vpop.eup %1100 }
 0x40c   : > { %v729_v15 = vpop.permute.xlu1 %728  ;;  %v472_v16 = vsel %vm278_vm1, %v1101_v13, 0.0  ;;  %v476_v23 = vpack.c.bf16 %v1101_v13, %v1101_v13 }
 0x40d   : > { %v731_v17 = vsub.f32 %v713_v47, %v729_v15  ;;  %473 = vadd.xlane.f32.xlu0 %v472_v16  ;;  %v340_v47 = vmul.f32 %v1272_v61, %v275_v42  ;;  %v276_v15 = vld [vmem:[#allocation4] sm:$0xff] }
 0x40f   : > { %v732_v18 = vmul.f32 1.442695, %v731_v17 }
 0x410   : > { %v481_v20 = vpop.permute.xlu1 %480 }
 0x411   : > { %1104 = vpow2.f32 %v732_v18  ;;  %v486_v21 = vsel %vm349_vm3, %v481_v20, 0 }
 0x412   : > { %1015 = vmatpush3.bf16.msra.mxu0 %v486_v21  ;;  %1106 = vpow2.f32 %v594_v24 }
 0x413   : > { %v1103_v22 = vpop.eup %1102  ;;  %1026 = vmatprep.subr.bf16.mxu0 %v1138_v0  ;;  %1108 = vpow2.f32 %v461_v35 }
 0x414   : > { %v605_v25 = vsel %vm278_vm1, %v1103_v22, 0.0  ;;  %v611_v26 = vpop.permute.xlu1 %610  ;;  %v609_v31 = vpack.c.bf16 %v1103_v22, %v1103_v22  ;;  %1110 = vpow2.f32 %v724_v39 }
 0x415   : > { %1017 = vmatmul.mubr.msk.bf16.vlgmr.msra.gmra.mrb[4].mxu0 %vm278_vm1, %v476_v23  ;;  %606 = vadd.xlane.f32.xlu1 %v605_v25  ;;  %v616_v27 = vsel %vm349_vm3, %v611_v26, 0 }
 0x416   : > { %1027 = vmatpush3.bf16.msra.mxu0 %v616_v27  ;;  %1028 = vmatprep.mubr.msk.bf16.mxu0 %vm1139_vm0, %v1138_v0 }
 0x417   : > { %1038 = vmatprep.subr.bf16.mxu0 %v1138_v0 }
 0x418   : > { %v741_v28 = vpop.permute.xlu1 %740 }
 0x419   : > { %v746_v32 = vsel %vm349_vm3, %v741_v28, 0 }
 0x41b   : > { %v1105_v29 = vpop.eup %1104 }
 0x41c   : > { %v735_v34 = vsel %vm278_vm1, %v1105_v29, 0.0  ;;  %v1107_v37 = vpop.eup %1106  ;;  %v739_v38 = vpack.c.bf16 %v1105_v29, %v1105_v29 }
 0x41d   : > { %1029 = vmatmul.mubr.msk.bf16.vlgmr.msra.gmra.mrb[8].mxu0 %vm278_vm1, %v609_v31  ;;  %736 = vadd.xlane.f32.xlu1 %v735_v34  ;;  %v1109_v40 = vpop.eup %1108  ;;  %v604_v46 = vmul.f32 %v1107_v37, %v275_v42 }
 0x41e   : > { %1039 = vmatpush3.bf16.msra.mxu0 %v746_v32  ;;  %1040 = vmatprep.mubr.msk.bf16.mxu0 %vm1139_vm0, %v1138_v0  ;;  %v1111_v41 = vpop.eup %1110  ;;  %v396_v0 = vpop.permute.xlu0 %395  ;;  %v471_v44 = vmul.f32 %v1109_v40, %v275_v42 }
 0x41f   : > { %v734_v52 = vmul.f32 %v1111_v41, %v275_v42  ;;  %v398_v17 = vmul.f32 %v396_v0, %v276_v15 }
 0x421   : > { %v399_v23 = vadd.f32 %v398_v17, %v1255_v33 }
 0x423   : > { %660 = vperm.xlu0 %1087, %v1107_v37  }
 0x425   : > { %1041 = vmatmul.mubr.msk.bf16.vlgmr.msra.gmra.mrb[12].mxu0 %vm278_vm1, %v739_v38 }
 0x427   : > { %1093 = vset.pattern.permute.xlu0 %v1147_v58 }
 0x42e   : > { %530 = vperm.xlu1 %1086, %v1109_v40  }
 0x432   : > { %1088 = vset.pattern.permute.xlu1 %v1147_v58 }
 0x433   : > { %790 = vperm.xlu1 %1088, %v1111_v41  }
 0x437   : > { %1089 = vset.pattern.permute.xlu1 %v1141_v11 }
 0x44a   : > { %v343_v14 = vpop.xlane.xlu1 %342 }
 0x44b   : > { %v344_v51 = vadd.f32 %v343_v14, %v340_v47 }
 0x49a   : > { %v474_v43 = vpop.xlane.xlu0 %473 }
 0x49b   : > { %v475_v48 = vadd.f32 %v474_v43, %v471_v44 }
 0x49d   : > { %v807_v55 = vsel %vm799_vm5, %v344_v51, %v475_v48 }
 0x4a2   : > { %v607_v45 = vpop.xlane.xlu1 %606  ;;  %v661_v16 = vpop.permute.xlu0 %660 }
 0x4a3   : > { %v608_v49 = vadd.f32 %v607_v45, %v604_v46  ;;  %v663_v20 = vmul.f32 %v661_v16, %v276_v15 }
 0x4a5   : > { %v808_v57 = vsel %vm801_vm6, %v807_v55, %v608_v49 }
 0x4aa   : > { %v737_v54 = vpop.xlane.xlu1 %736 }
 0x4ab   : > { %v738_v56 = vadd.f32 %v737_v54, %v734_v52 }
 0x4ad   : > { %v809_v11 = vsel %vm803_vm7, %v808_v57, %v738_v56 }
 0x4ae   : > { %810 = vst.msk [vmem:[#allocation3] sm:$0xff] %vm266_vm2, %v809_v11 }
 0x4b5   : > { %v821_v59 = vld [vmem:[#allocation3] sm:$0xff] }
 0x4b6   : > { %1112 = vrcp.f32 %v821_v59 }
 0x4c0   : > { %v1113_v60 = vpop.eup %1112 }
 0x4c1   : > { %826 = vperm.xlu1 %1089, %v1113_v60  }
 0x4c5   : > { %1090 = vset.pattern.permute.xlu1 %v1145_v50 }
 0x4c6   : > { %831 = vperm.xlu1 %1090, %v1113_v60  }
 0x4ca   : > { %1091 = vset.pattern.permute.xlu1 %v1146_v53  ;;  %v531_v53 = vpop.permute.xlu1 %530 }
 0x4cb   : > { %v533_v18 = vmul.f32 %v531_v53, %v276_v15 }
 0x4ce   : > { %v791_v9 = vpop.permute.xlu1 %790 }
 0x4cf   : > { %v793_v24 = vmul.f32 %v791_v9, %v276_v15 }
 0x4e8   : > { %v522_v61 = vpop.f32.mrb[4].mxu0 }
 0x4e9   : > { %535 = vrot.lane.b32.xlu1 %v522_v61, %s1148_s29  ;;  %v1018_v62 = vpop.f32.mrb[5].mxu0 }
 0x4ea   : > { %v525_v63 = vpop.f32.mrb[6].mxu0 }
 0x4eb   : > { %v1019_v1 = vpop.f32.mrb[7].mxu0 }
 0x4f0   : > { %v652_v2 = vpop.f32.mrb[8].mxu0 }
 0x4f1   : > { %665 = vrot.lane.b32.xlu1 %v652_v2, %s1149_s30  ;;  %v1030_v3 = vpop.f32.mrb[9].mxu0 }
 0x4f2   : > { %v655_v4 = vpop.f32.mrb[10].mxu0 }
 0x4f3   : > { %v1031_v5 = vpop.f32.mrb[11].mxu0 }
 0x4f8   : > { %v782_v6 = vpop.f32.mrb[12].mxu0 }
 0x4f9   : > { %795 = vrot.lane.b32.xlu1 %v782_v6, %s1150_s4  ;;  %v1042_v7 = vpop.f32.mrb[13].mxu0 }
 0x4fa   : > { %v785_v50 = vpop.f32.mrb[14].mxu0 }
 0x4fb   : > { %v1043_v8 = vpop.f32.mrb[15].mxu0 }
 0x4fd   : > { %836 = vperm.xlu1 %1091, %v1113_v60  }
 0x501   : > { %1092 = vset.pattern.permute.xlu1 %v1147_v58 }
 0x502   : > { %841 = vperm.xlu1 %1092, %v1113_v60  }
 0x540   : > { %v827_v10 = vpop.permute.xlu1 %826 }
 0x545   : > { %v832_v12 = vpop.permute.xlu1 %831 }
 0x55b   : > { %v536_v13 = vpop.permute.xlu1 %535 }
 0x55c   : > { %v538_v21 = vadd.f32 %v536_v13, %v533_v18 }
 0x55e   : > { %v811_v25 = vsel %vm278_vm1, %v399_v23, %v538_v21 }
 0x563   : > { %v666_v19 = vpop.permute.xlu1 %665 }
 0x564   : > { %v668_v22 = vadd.f32 %v666_v19, %v663_v20 }
 0x566   : > { %v813_v27 = vsel %vm812_vm8, %v811_v25, %v668_v22 }
 0x56b   : > { %v796_v58 = vpop.permute.xlu1 %795 }
 0x56c   : > { %v798_v26 = vadd.f32 %v796_v58, %v793_v24 }
 0x56e   : > { %v815_v28 = vsel %vm814_vm9, %v813_v27, %v798_v26 }
 0x56f   : > { %817 = vst.msk [vmem:[#allocation4] sm:$0xff] %vm269_vm4, %v815_v28 }
 0x576   : > { %v822_v29 = vld [vmem:[#allocation4] sm:$0xff] }
 0x577   : > { %v829_v31 = vmul.f32 %v827_v10, %v822_v29  ;;  %v834_v32 = vmul.f32 %v832_v12, %v822_v29 }
 0x579   : > { %v845_v35 = vsel %vm278_vm1, %v829_v31, %v834_v32 }
 0x57c   : > { %v837_v30 = vpop.permute.xlu1 %836 }
 0x57d   : > { %v839_v34 = vmul.f32 %v837_v30, %v822_v29 }
 0x57f   : > { %v846_v37 = vsel %vm812_vm8, %v845_v35, %v839_v34 }
 0x581   : > { %v842_v33 = vpop.permute.xlu1 %841 }
 0x582   : > { %v844_v36 = vmul.f32 %v842_v33, %v822_v29 }
 0x584   : > { %v847_v38 = vsel %vm814_vm9, %v846_v37, %v844_v36 }
 0x585   : > { %v848_v39 = vpack.c.bf16 %v847_v38, %v847_v38 }
 0x587   : > { %850 = vst.msk [vmem:[%s259_s7] sm:$0xf] %vm849_vm10, %v848_v39 }
 0x588 PF: > { %s13_s14 = sadd.s32 1, %s1136_s14   ;;  %s1347_s12 = smov %s1132_s13 }
 0x589   : > { %p10_p5 = scmp.ge.s32.totalorder %s13_s14, 4   ;;  %s1348_s13 = smov %s1350_s15 }
 0x58b   :  { %12 = sbr.rel (!%p10_p5) target bundleno = 2 (0x2), region = 76 }

// kernel: _lambda_.27
= control target key start
LH: loop header
LB: loop body
LE: loop exit
PB: predicated region body
PF: predicated region fallthrough
CT: control target
= control target key end

     0   :  { %vm19_vm0 = vcmask 254976   ;;  %v210_v3 = vmov 0.0|0.0   ;;  %v211_v6 = vmov 0.0   ;;  %vm26_vm1 = vcmask 261120   ;;  %s269_s0 = inlined_call_operand.vmem [shape: bf16[2,8,32], index: 0, kind: input, shape index: {}]   ;;  %s270_s1 = inlined_call_operand.vmem [shape: f32[32,3], index: 1, kind: input, shape index: {}]   ;;  %s271_s2 = inlined_call_operand.vmem [shape: f32[1,3], index: 2, kind: input, shape index: {}]   ;;  %s272_s3 = inlined_call_operand.hbm [shape: f32[2,3], index: 3, kind: output, shape index: {}]  }
   0x1   :  { %v54_v0 = vld [vmem:[%s270_s1] sm:$0xff]  ;;  %v55_v1 = vld [vmem:[%s270_s1 + $0x8] sm:$0xff]  ;;  %v56_v2 = vld [vmem:[%s270_s1 + $0x10] sm:$0xff]  ;;  %176 = vmatprep.subr.bf16.mxu0 %v210_v3  ;;  %20 = vst.msk [vmem:[#allocation2] sm:$0x3] %vm19_vm0, %v211_v6  ;;  %vm212_vm2 = vmmov 0  }
   0x2   :  { %v177_v4 = vpack.c.bf16 %v55_v1, %v54_v0  ;;  %v57_v5 = vld [vmem:[%s270_s1 + $0x18] sm:$0xff]  ;;  %v157_v7 = vld [vmem:[%s269_s0] sm:$0xff]   ;;  %173 = vmatprep.mubr.msk.f32.mxu0 %vm212_vm2, %v211_v6 }
   0x3   :  { %v158_v8 = vunpack.c.l.bf16 %v157_v7  ;;  %v159_v9 = vunpack.c.h.bf16 %v157_v7 }
   0x4   :  { %8 = vsyncpa [#allocation4], 0  ;;  %178 = vmatpush3.bf16.msra.mxu0 %v177_v4  ;;  %v180_v10 = vpack.c.bf16 %v57_v5, %v56_v2  ;;  %vm43_vm3 = vcmask 1041409   ;;  %v154_v30 = vld [vmem:[%s271_s2] ss:$0 sm:$0xff]  ;;  %s213_s22 = smov [#allocation3]  }
   0x5   :  { %179 = vmatprep.subr.bf16.mxu0 %v210_v3  ;;  %v27_v11 = vsel %vm26_vm1, %v158_v8, 0.0  ;;  %v34_v12 = vsel %vm26_vm1, %v159_v9, 0.0  ;;  %s146_s23 = sshll.u32 %s213_s22, 4  ;;  %vm138_vm4 = vcmask 17408   ;;  %s147_s23 = int_to_ptr.vmem [resolvable:$true] %s146_s23 }
   0x6   :  { %v28_v13 = vrot.slane %v27_v11, 4  ;;  %v35_v14 = vrot.slane %v34_v12, 4  ;;  %s186_s24 = scalar_lea.vmem %s147_s23, 32  ;;  %p191_p1 = scmp.lt.s32.totalorder %s147_s23, %s147_s23 }
   0x7   :  { %p187_p0 = scmp.ne.s32.totalorder %s147_s23, %s186_s24  ;;  %p192_p2 = scmp.lt.s32.totalorder %s186_s24, %s186_s24 }
   0x8   :  { %181 = vmatpush3.bf16.msra.mxu0 %v180_v10  ;;  %v29_v15 = vadd.f32 %v28_v13, %v27_v11  ;;  %v36_v16 = vadd.f32 %v35_v14, %v34_v12  ;;  %v21_v23 = vld [vmem:[#allocation2] sm:$0x3] }
   0x9   :  { %p193_p3 = por %p192_p2, %p191_p1 }
   0xa   :  { %v30_v17 = vrot.slane %v29_v15, 2  ;;  %v37_v18 = vrot.slane %v36_v16, 2 }
   0xb   :  { %p194_p4 = pnand %p193_p3, %p187_p0 }
   0xc   :  { %v31_v19 = vadd.f32 %v30_v17, %v29_v15  ;;  %v38_v20 = vadd.f32 %v37_v18, %v36_v16 }
   0xe   :  { %v32_v21 = vrot.slane %v31_v19, 1  ;;  %v39_v22 = vrot.slane %v38_v20, 1 }
  0x10   :  { %v33_v24 = vadd.f32 %v32_v21, %v31_v19  ;;  %v40_v25 = vadd.f32 %v39_v22, %v38_v20 }
  0x12   :  { %v44_v26 = vsel %vm43_vm3, %v40_v25, %v33_v24 }
  0x13   :  { %v46_v27 = vadd.f32 %v44_v26, %v21_v23 }
  0x15   :  { %48 = vst.msk [vmem:[#allocation2] sm:$0x3] %vm19_vm0, %v46_v27 }
  0x1c   :  { %v52_v28 = vld [vmem:[#allocation2] sm:$0x3] }
  0x1d   :  { %v53_v29 = vmul.f32 0.125, %v52_v28 }
  0x1f   :  { %174 = vmatmul.mubr.msk.f32.vlgmr.msra.gmra.mrb[0].mxu0 %vm26_vm1, %v53_v29 }
  0xf2   :  { %v134_v31 = vpop.f32.mrb[0].mxu0 }
  0xf3   :  { %v135_v32 = vadd.f32 %v154_v30, %v134_v31  ;;  %v175_v33 = vpop.f32.mrb[1].mxu0 }
  0xf5   :  { %139 = vst.msk [vmem:[#allocation3] sm:$0x3] %vm138_vm4, %v135_v32 }
  0xf6   :  { %197 = shalt.err (!%p194_p4)
}
  0xf7   :  { %s198_s27 = scalar_lea.hbm %s272_s3, 32 }
  0xf8   :  { %p199_p5 = scmp.ne.s32.totalorder %s272_s3, %s198_s27  ;;  %p202_p6 = scmp.lt.u32.totalorder %s198_s27, %s272_s3 }
  0xfa   :  { %p204_p7 = pnand %p202_p6, %p199_p5 }
  0xfc   :  { %207 = shalt.err (!%p204_p7)
}
  0xfd   :  { %149 = dma.vmem_to_hbm [thread:$0]  %s147_s23, 32, %s272_s3, [#allocation4]  }
  0xfe   :  { %208 = dma.done.wait [#allocation4], 32  }
  0xff   :  { %209 = vsyncadd [#allocation4], 4294967264 }
 0x100   :  { %153 = vsyncpa [#allocation4], 1 }

// kernel: _lambda_.20
= control target key start
LH: loop header
LB: loop body
LE: loop exit
PB: predicated region body
PF: predicated region fallthrough
CT: control target
= control target key end

     0   :  { %v2617_v3 = vmov 0   ;;  %vm310_vm0 = vcmask 261120   ;;  %vm2122_vm1 = vcmask 257024   ;;  %s3277_s1 = inlined_call_operand.vmem [shape: bf16[32,2048], index: 1, kind: input, shape index: {}]   ;;  %s3278_s0 = inlined_call_operand.vmem [shape: bf16[16,32], index: 0, kind: input, shape index: {}]   ;;  %s3279_s3 = inlined_call_operand.vmem [shape: bf16[2048,32], index: 3, kind: input, shape index: {}]   ;;  %s3280_s2 = inlined_call_operand.vmem [shape: f32[1,2048], index: 2, kind: input, shape index: {}]   ;;  %s3281_s4 = inlined_call_operand.vmem [shape: f32[1,32], index: 4, kind: input, shape index: {}, may-alias: {4,6}]   ;;  %s3282_s5 = inlined_call_operand.vmem [shape: f32[1,32], index: 5, kind: input, shape index: {}]   ;;  %s3283_s6 = inlined_call_operand.vmem [shape: f32[1,32], index: 6, kind: input, shape index: {}, may-alias: {4,6}]   ;;  %s3284_s7 = inlined_call_operand.vmem [shape: bf16[16,32], index: 7, kind: output, shape index: {}]  }
   0x1   :  { %v29_v0 = vld [vmem:[%s3277_s1] sm:$0xff]  ;;  %v30_v2 = vld [vmem:[%s3277_s1 + $0x8] sm:$0xff]  ;;  %346 = vmatprep.mubr.bf16.mxu0 %v2617_v3  ;;  %389 = vmatprep.mubr.bf16.mxu1 %v2617_v3  ;;  %v31_v15 = vld [vmem:[%s3277_s1 + $0x10] sm:$0xff] }
   0x2   :  { %v37_v1 = vld [vmem:[%s3277_s1 + $0x40] sm:$0xff]  ;;  %v38_v5 = vld [vmem:[%s3277_s1 + $0x48] sm:$0xff]  ;;  %v39_v16 = vld [vmem:[%s3277_s1 + $0x50] sm:$0xff] }
   0x3   :  { %v2131_v4 = vcombine.high %v29_v0, %v37_v1  ;;  %v2130_v6 = vcombine.low %v29_v0, %v37_v1  ;;  %v45_v7 = vld [vmem:[%s3277_s1 + $0x80] sm:$0xff]  ;;  %v2133_v9 = vcombine.high %v30_v2, %v38_v5  ;;  %v2132_v10 = vcombine.low %v30_v2, %v38_v5  ;;  %v46_v12 = vld [vmem:[%s3277_s1 + $0x88] sm:$0xff]  ;;  %v32_v17 = vld [vmem:[%s3277_s1 + $0x18] sm:$0xff] }
   0x4   :  { %v53_v8 = vld [vmem:[%s3277_s1 + $0xc0] sm:$0xff]  ;;  %v54_v13 = vld [vmem:[%s3277_s1 + $0xc8] sm:$0xff]  ;;  %v40_v20 = vld [vmem:[%s3277_s1 + $0x58] sm:$0xff]  ;;  %v2135_v22 = vcombine.high %v31_v15, %v39_v16  ;;  %v2134_v28 = vcombine.low %v31_v15, %v39_v16 }
   0x5   :  { %v2147_v11 = vcombine.high %v45_v7, %v53_v8  ;;  %314 = vmatprep.subr.bf16.mxu0 %v2131_v4  ;;  %v2149_v14 = vcombine.high %v46_v12, %v54_v13  ;;  %357 = vmatprep.subr.bf16.mxu1 %v2133_v9  ;;  %v2146_v18 = vcombine.low %v45_v7, %v53_v8  ;;  %v2696_v19 = vld [vmem:[%s3278_s0] sm:$0xff]   ;;  %v47_v24 = vld [vmem:[%s3277_s1 + $0x90] sm:$0xff]  ;;  %v48_v26 = vld [vmem:[%s3277_s1 + $0x98] sm:$0xff] }
   0x6   :  { %315 = vmatpush1.bf16.msra.mxu0 %v2130_v6  ;;  %358 = vmatpush1.bf16.msra.mxu1 %v2132_v10  ;;  %v2148_v21 = vcombine.low %v46_v12, %v54_v13  ;;  %v2137_v23 = vcombine.high %v32_v17, %v40_v20  ;;  %v55_v25 = vld [vmem:[%s3277_s1 + $0xd0] sm:$0xff]  ;;  %v56_v27 = vld [vmem:[%s3277_s1 + $0xd8] sm:$0xff]  ;;  %v2136_v29 = vcombine.low %v32_v17, %v40_v20  ;;  %v33_v32 = vld [vmem:[%s3277_s1 + $0x20] sm:$0xff] }
   0x7   :  { %316 = vmatprep.subr.bf16.mxu0 %v2147_v11  ;;  %359 = vmatprep.subr.bf16.mxu1 %v2149_v14  ;;  %v2151_v30 = vcombine.high %v47_v24, %v55_v25  ;;  %v2153_v31 = vcombine.high %v48_v26, %v56_v27  ;;  %v41_v33 = vld [vmem:[%s3277_s1 + $0x60] sm:$0xff]  ;;  %v34_v34 = vld [vmem:[%s3277_s1 + $0x28] sm:$0xff]  ;;  %v2150_v36 = vcombine.low %v47_v24, %v55_v25  ;;  %v35_v45 = vld [vmem:[%s3277_s1 + $0x30] sm:$0xff] }
   0x8   :  { %v42_v35 = vld [vmem:[%s3277_s1 + $0x68] sm:$0xff]  ;;  %v49_v37 = vld [vmem:[%s3277_s1 + $0xa0] sm:$0xff]  ;;  %v2152_v38 = vcombine.low %v48_v26, %v56_v27  ;;  %v2139_v39 = vcombine.high %v33_v32, %v41_v33  ;;  %v2138_v44 = vcombine.low %v33_v32, %v41_v33  ;;  %v43_v48 = vld [vmem:[%s3277_s1 + $0x70] sm:$0xff] }
   0x9   :  { %v57_v40 = vld [vmem:[%s3277_s1 + $0xe0] sm:$0xff]  ;;  %v2141_v41 = vcombine.high %v34_v34, %v42_v35  ;;  %v50_v42 = vld [vmem:[%s3277_s1 + $0xa8] sm:$0xff]  ;;  %v2140_v46 = vcombine.low %v34_v34, %v42_v35  ;;  %v36_v50 = vld [vmem:[%s3277_s1 + $0x38] sm:$0xff]  ;;  %v2143_v55 = vcombine.high %v35_v45, %v43_v48  ;;  %v2142_v60 = vcombine.low %v35_v45, %v43_v48 }
   0xa   :  { %317 = vmatpush1.bf16.msra.mxu0 %v2146_v18  ;;  %360 = vmatpush1.bf16.msra.mxu1 %v2148_v21  ;;  %v58_v43 = vld [vmem:[%s3277_s1 + $0xe8] sm:$0xff]  ;;  %v2155_v47 = vcombine.high %v49_v37, %v57_v40  ;;  %v44_v51 = vld [vmem:[%s3277_s1 + $0x78] sm:$0xff]  ;;  %v2154_v52 = vcombine.low %v49_v37, %v57_v40  ;;  %v51_v53 = vld [vmem:[%s3277_s1 + $0xb0] sm:$0xff] }
   0xb   :  { %400 = vmatprep.subr.bf16.mxu0 %v2135_v22  ;;  %443 = vmatprep.subr.bf16.mxu1 %v2137_v23  ;;  %v2157_v49 = vcombine.high %v50_v42, %v58_v43  ;;  %v2156_v54 = vcombine.low %v50_v42, %v58_v43  ;;  %v59_v56 = vld [vmem:[%s3277_s1 + $0xf0] sm:$0xff]  ;;  %v2145_v57 = vcombine.high %v36_v50, %v44_v51  ;;  %v52_v58 = vld [vmem:[%s3277_s1 + $0xb8] sm:$0xff]  ;;  %v2483_v1 = vld [vmem:[%s3279_s3 + $0x40] sm:$0xff]  }
   0xc   :  { %v60_v59 = vld [vmem:[%s3277_s1 + $0xf8] sm:$0xff]  ;;  %v2144_v61 = vcombine.low %v36_v50, %v44_v51  ;;  %v2159_v62 = vcombine.high %v51_v53, %v59_v56  ;;  %v2158_v0 = vcombine.low %v51_v53, %v59_v56  ;;  %v2484_v4 = vld [vmem:[%s3279_s3 + $0xc0] sm:$0xff]   ;;  %v2487_v7 = vld [vmem:[%s3279_s3 + $0x48] sm:$0xff]  }
   0xd   :  { %2162 = vmatmul.mubr.msk.bf16.vlgmr.msra.gmra.mrb[0].mxu0 %vm310_vm0, %v2696_v19  ;;  %2163 = vmatmul.mubr.msk.bf16.vlgmr.msra.gmra.mrb[0].mxu1 %vm310_vm0, %v2696_v19  ;;  %v2161_v63 = vcombine.high %v52_v58, %v60_v59  ;;  %v2160_v2 = vcombine.low %v52_v58, %v60_v59  ;;  %v2485_v5 = vld [vmem:[%s3279_s3] sm:$0xff]   ;;  %v2488_v8 = vld [vmem:[%s3279_s3 + $0xc8] sm:$0xff]   ;;  %v2491_v10 = vld [vmem:[%s3279_s3 + $0x50] sm:$0xff]  }
   0xe   :  { %401 = vmatpush1.bf16.msra.mxu0 %v2134_v28  ;;  %444 = vmatpush1.bf16.msra.mxu1 %v2136_v29  ;;  %v2486_v6 = vld [vmem:[%s3279_s3 + $0x80] sm:$0xff]   ;;  %v2490_v9 = vld [vmem:[%s3279_s3 + $0x88] sm:$0xff]   ;;  %v2492_v11 = vld [vmem:[%s3279_s3 + $0xd0] sm:$0xff]  }
   0xf   :  { %402 = vmatprep.subr.bf16.mxu0 %v2151_v30  ;;  %445 = vmatprep.subr.bf16.mxu1 %v2153_v31  ;;  %v2493_v12 = vld [vmem:[%s3279_s3 + $0x10] sm:$0xff]   ;;  %v2495_v14 = vld [vmem:[%s3279_s3 + $0x58] sm:$0xff]   ;;  %v2499_v18 = vld [vmem:[%s3279_s3 + $0x60] sm:$0xff]  }
  0x10   :  { %432 = vmatprep.mubr.bf16.mxu0 %v2617_v3  ;;  %475 = vmatprep.mubr.bf16.mxu1 %v2617_v3  ;;  %v2494_v13 = vld [vmem:[%s3279_s3 + $0x90] sm:$0xff]   ;;  %v2496_v15 = vld [vmem:[%s3279_s3 + $0xd8] sm:$0xff]   ;;  %v2501_v20 = vld [vmem:[%s3279_s3 + $0x20] sm:$0xff]  }
  0x11   :  { %v2497_v16 = vld [vmem:[%s3279_s3 + $0x18] sm:$0xff]   ;;  %v2502_v21 = vld [vmem:[%s3279_s3 + $0xa0] sm:$0xff]   ;;  %v2503_v22 = vld [vmem:[%s3279_s3 + $0x68] sm:$0xff]  }
  0x12   :  { %403 = vmatpush1.bf16.msra.mxu0 %v2150_v36  ;;  %446 = vmatpush1.bf16.msra.mxu1 %v2152_v38  ;;  %v2498_v17 = vld [vmem:[%s3279_s3 + $0x98] sm:$0xff]   ;;  %v2504_v23 = vld [vmem:[%s3279_s3 + $0xe8] sm:$0xff]   ;;  %v2507_v26 = vld [vmem:[%s3279_s3 + $0x70] sm:$0xff]   ;;  %v65_v36 = vlaneseq }
  0x13   :  { %486 = vmatprep.subr.bf16.mxu0 %v2139_v39  ;;  %529 = vmatprep.subr.bf16.mxu1 %v2141_v41  ;;  %v2505_v24 = vld [vmem:[%s3279_s3 + $0x28] sm:$0xff]   ;;  %v2508_v27 = vld [vmem:[%s3279_s3 + $0xf0] sm:$0xff]   ;;  %v2511_v30 = vld [vmem:[%s3279_s3 + $0x78] sm:$0xff]  }
  0x14   :  { %v2506_v25 = vld [vmem:[%s3279_s3 + $0xa8] sm:$0xff]   ;;  %v2509_v28 = vld [vmem:[%s3279_s3 + $0x30] sm:$0xff]   ;;  %v2512_v31 = vld [vmem:[%s3279_s3 + $0xf8] sm:$0xff]   ;;  %v2885_v37 = vshrl.u32 %v65_v36, 7 }
  0x15   :  { %2164 = vmatmul.mubr.msk.bf16.vlgmr.msra.gmra.mrb[4].mxu0 %vm310_vm0, %v2696_v19  ;;  %2165 = vmatmul.mubr.msk.bf16.vlgmr.msra.gmra.mrb[4].mxu1 %vm310_vm0, %v2696_v19  ;;  %v2510_v29 = vld [vmem:[%s3279_s3 + $0xb0] sm:$0xff]   ;;  %v2513_v32 = vld [vmem:[%s3279_s3 + $0x38] sm:$0xff]   ;;  %v2515_v34 = vld [vmem:[%s3279_s3 + $0x140] sm:$0xff]  }
  0x16   :  { %487 = vmatpush1.bf16.msra.mxu0 %v2138_v44  ;;  %530 = vmatpush1.bf16.msra.mxu1 %v2140_v46  ;;  %v2514_v33 = vld [vmem:[%s3279_s3 + $0xb8] sm:$0xff]   ;;  %v2516_v35 = vld [vmem:[%s3279_s3 + $0x1c0] sm:$0xff]   ;;  %v67_v38 = vsub.s32 0, %v2885_v37  ;;  %v75_v40 = vsub.s32 2, %v2885_v37  ;;  %v71_v41 = vsub.s32 1, %v2885_v37  ;;  %v79_v42 = vsub.s32 3, %v2885_v37 }
  0x17   :  { %488 = vmatprep.subr.bf16.mxu0 %v2155_v47  ;;  %531 = vmatprep.subr.bf16.mxu1 %v2157_v49  ;;  %v61_v39 = vld [vmem:[%s3280_s2] sm:$0xff]  ;;  %v83_v47 = vsub.s32 4, %v2885_v37  ;;  %v87_v49 = vsub.s32 5, %v2885_v37 }
  0x18   :  { %518 = vmatprep.mubr.bf16.mxu0 %v2617_v3  ;;  %561 = vmatprep.mubr.bf16.mxu1 %v2617_v3  ;;  %v68_v43 = vrot.slane %v61_v39, %v67_v38  ;;  %v76_v44 = vrot.slane %v61_v39, %v75_v40  ;;  %v72_v45 = vrot.slane %v61_v39, %v71_v41 }
  0x19   :  { %v80_v46 = vrot.slane %v61_v39, %v79_v42 }
  0x1a   :  { %489 = vmatpush1.bf16.msra.mxu0 %v2154_v52  ;;  %532 = vmatpush1.bf16.msra.mxu1 %v2156_v54 }
  0x1b   :  { %572 = vmatprep.subr.bf16.mxu0 %v2143_v55  ;;  %615 = vmatprep.subr.bf16.mxu1 %v2145_v57  ;;  %v91_v57 = vsub.s32 6, %v2885_v37 }
  0x1d   :  { %2166 = vmatmul.mubr.msk.bf16.vlgmr.msra.gmra.mrb[8].mxu0 %vm310_vm0, %v2696_v19  ;;  %2167 = vmatmul.mubr.msk.bf16.vlgmr.msra.gmra.mrb[8].mxu1 %vm310_vm0, %v2696_v19 }
  0x1e   :  { %573 = vmatpush1.bf16.msra.mxu0 %v2142_v60  ;;  %616 = vmatpush1.bf16.msra.mxu1 %v2144_v61 }
  0x1f   :  { %574 = vmatprep.subr.bf16.mxu0 %v2159_v62  ;;  %617 = vmatprep.subr.bf16.mxu1 %v2161_v63  ;;  %v84_v62 = vrot.slane %v61_v39, %v83_v47  ;;  %v95_v63 = vsub.s32 7, %v2885_v37  ;;  %v2535_v37 = vld [vmem:[%s3279_s3 + $0x168] sm:$0xff]  }
  0x20   :  { %604 = vmatprep.mubr.bf16.mxu0 %v2617_v3  ;;  %647 = vmatprep.mubr.bf16.mxu1 %v2617_v3  ;;  %v2489_v3 = vld [vmem:[%s3279_s3 + $0x8] sm:$0xff]  }
  0x22   :  { %575 = vmatpush1.bf16.msra.mxu0 %v2158_v0  ;;  %618 = vmatpush1.bf16.msra.mxu1 %v2160_v2 }
  0x23   :  { %2305 = vmatprep.subr.bf16.mxu0 %v2483_v1  ;;  %2327 = vmatprep.subr.bf16.mxu1 %v2484_v4 }
  0x25   :  { %2168 = vmatmul.mubr.msk.bf16.vlgmr.msra.gmra.mrb[12].mxu0 %vm310_vm0, %v2696_v19  ;;  %2169 = vmatmul.mubr.msk.bf16.vlgmr.msra.gmra.mrb[12].mxu1 %vm310_vm0, %v2696_v19  ;;  %v2500_v19 = vld [vmem:[%s3279_s3 + $0xe0] sm:$0xff]  }
  0x26   :  { %2306 = vmatpush3.bf16.msra.mxu0 %v2485_v5  ;;  %2328 = vmatpush3.bf16.msra.mxu1 %v2486_v6  ;;  %v88_v5 = vrot.slane %v61_v39, %v87_v49 }
  0x27   :  { %2307 = vmatprep.subr.bf16.mxu0 %v2487_v7  ;;  %2329 = vmatprep.subr.bf16.mxu1 %v2488_v8 }
  0x2a   :  { %2308 = vmatpush3.bf16.msra.mxu0 %v2489_v3  ;;  %2330 = vmatpush3.bf16.msra.mxu1 %v2490_v9 }
  0x2b   :  { %2309 = vmatprep.subr.bf16.mxu0 %v2491_v10  ;;  %2331 = vmatprep.subr.bf16.mxu1 %v2492_v11 }
  0x2e   :  { %2310 = vmatpush3.bf16.msra.mxu0 %v2493_v12  ;;  %2332 = vmatpush3.bf16.msra.mxu1 %v2494_v13  ;;  %v92_v12 = vrot.slane %v61_v39, %v91_v57 }
  0x2f   :  { %2311 = vmatprep.subr.bf16.mxu0 %v2495_v14  ;;  %2333 = vmatprep.subr.bf16.mxu1 %v2496_v15  ;;  %v96_v15 = vrot.slane %v61_v39, %v95_v63  ;;  %v2521_v39 = vld [vmem:[%s3279_s3 + $0x108] sm:$0xff]  }
  0x32   :  { %2312 = vmatpush3.bf16.msra.mxu0 %v2497_v16  ;;  %2334 = vmatpush3.bf16.msra.mxu1 %v2498_v17 }
  0x33   :  { %2313 = vmatprep.subr.bf16.mxu0 %v2499_v18  ;;  %2335 = vmatprep.subr.bf16.mxu1 %v2500_v19  ;;  %v2517_v18 = vld [vmem:[%s3279_s3 + $0x100] sm:$0xff]  }
  0x36   :  { %2314 = vmatpush3.bf16.msra.mxu0 %v2501_v20  ;;  %2336 = vmatpush3.bf16.msra.mxu1 %v2502_v21  ;;  %v2518_v21 = vld [vmem:[%s3279_s3 + $0x180] sm:$0xff]  }
  0x37   :  { %2315 = vmatprep.subr.bf16.mxu0 %v2503_v22  ;;  %2337 = vmatprep.subr.bf16.mxu1 %v2504_v23  ;;  %v2519_v22 = vld [vmem:[%s3279_s3 + $0x148] sm:$0xff]  }
  0x3a   :  { %2316 = vmatpush3.bf16.msra.mxu0 %v2505_v24  ;;  %2338 = vmatpush3.bf16.msra.mxu1 %v2506_v25 }
  0x3b   :  { %2317 = vmatprep.subr.bf16.mxu0 %v2507_v26  ;;  %2339 = vmatprep.subr.bf16.mxu1 %v2508_v27  ;;  %v2520_v26 = vld [vmem:[%s3279_s3 + $0x1c8] sm:$0xff]  }
  0x3e   :  { %2318 = vmatpush3.bf16.msra.mxu0 %v2509_v28  ;;  %2340 = vmatpush3.bf16.msra.mxu1 %v2510_v29 }
  0x3f   :  { %2319 = vmatprep.subr.bf16.mxu0 %v2511_v30  ;;  %2341 = vmatprep.subr.bf16.mxu1 %v2512_v31  ;;  %v2929_v31 = vld [vmem:[%s3280_s2 + $0x8] sm:$0xff] }
  0x42   :  { %2320 = vmatpush3.bf16.msra.mxu0 %v2513_v32  ;;  %2342 = vmatpush3.bf16.msra.mxu1 %v2514_v33 }
  0x43   :  { %2349 = vmatprep.subr.bf16.mxu0 %v2515_v34  ;;  %2371 = vmatprep.subr.bf16.mxu1 %v2516_v35 }
  0xe0   :  { %v348_v48 = vpop.f32.mrb[0].mxu0  ;;  %v391_v51 = vpop.f32.mrb[0].mxu1 }
  0xe1   :  { %v349_v50 = vadd.f32 %v348_v48, %v68_v43  ;;  %v350_v52 = vpop.f32.mrb[1].mxu0  ;;  %v392_v53 = vadd.f32 %v391_v51, %v76_v44  ;;  %v393_v55 = vpop.f32.mrb[1].mxu1  ;;  %v2523_v51 = vld [vmem:[%s3279_s3 + $0x150] sm:$0xff]  }
  0xe2   :  { %v351_v54 = vadd.f32 %v350_v52, %v72_v45  ;;  %v352_v56 = vpop.f32.mrb[2].mxu0  ;;  %v394_v58 = vadd.f32 %v393_v55, %v80_v46  ;;  %v395_v60 = vpop.f32.mrb[2].mxu1  ;;  %v100_v55 = vrot.slane %v2929_v31, %v67_v38  ;;  %v112_v38 = vrot.slane %v2929_v31, %v79_v42 }
  0xe3   :  { %v353_v59 = vadd.f32 %v352_v56, %v68_v43  ;;  %v354_v61 = vpop.f32.mrb[3].mxu0  ;;  %v660_v0 = vmax.f32 %v392_v53, 0.0  ;;  %v396_v1 = vadd.f32 %v395_v60, %v76_v44  ;;  %v397_v4 = vpop.f32.mrb[3].mxu1  ;;  %v658_v6 = vmax.f32 %v349_v50, 0.0  ;;  %v2522_v50 = vld [vmem:[%s3279_s3 + $0x188] sm:$0xff]   ;;  %v2524_v56 = vld [vmem:[%s3279_s3 + $0x1d0] sm:$0xff]  }
  0xe4   :  { %v355_v2 = vadd.f32 %v354_v61, %v72_v45  ;;  %v661_v7 = vmax.f32 %v394_v58, 0.0  ;;  %v398_v3 = vadd.f32 %v397_v4, %v80_v46  ;;  %v659_v9 = vmax.f32 %v351_v54, 0.0 }
  0xe5   :  { %v674_v8 = vmax.f32 %v353_v59, 0.0  ;;  %v676_v10 = vmax.f32 %v396_v1, 0.0  ;;  %v104_v60 = vrot.slane %v2929_v31, %v71_v41  ;;  %v108_v61 = vrot.slane %v2929_v31, %v75_v40  ;;  %v2525_v1 = vld [vmem:[%s3279_s3 + $0x110] sm:$0xff]  }
  0xe6   :  { %v675_v11 = vmax.f32 %v355_v2, 0.0  ;;  %v677_v14 = vmax.f32 %v398_v3, 0.0  ;;  %v2526_v40 = vld [vmem:[%s3279_s3 + $0x190] sm:$0xff]   ;;  %v2528_v3 = vld [vmem:[%s3279_s3 + $0x1d8] sm:$0xff]  }
  0xe7   :  { %v690_v13 = vpack.c.bf16 %v674_v8, %v658_v6  ;;  %v692_v16 = vpack.c.bf16 %v676_v10, %v660_v0 }
  0xe8   :  { %v691_v17 = vpack.c.bf16 %v675_v11, %v659_v9  ;;  %v434_v19 = vpop.f32.mrb[4].mxu0  ;;  %v693_v20 = vpack.c.bf16 %v677_v14, %v661_v7  ;;  %v477_v25 = vpop.f32.mrb[4].mxu1 }
  0xe9   :  { %v435_v23 = vadd.f32 %v434_v19, %v84_v62  ;;  %v436_v24 = vpop.f32.mrb[5].mxu0  ;;  %v478_v29 = vadd.f32 %v477_v25, %v92_v12  ;;  %v479_v30 = vpop.f32.mrb[5].mxu1  ;;  %v2531_v25 = vld [vmem:[%s3279_s3 + $0x160] sm:$0xff]  }
  0xea   :  { %1769 = vmatprep.mubr.bf16.mxu0 %v691_v17  ;;  %v437_v27 = vadd.f32 %v436_v24, %v88_v5  ;;  %v438_v28 = vpop.f32.mrb[6].mxu0  ;;  %1810 = vmatprep.mubr.bf16.mxu1 %v693_v20  ;;  %v480_v35 = vadd.f32 %v479_v30, %v96_v15  ;;  %v481_v36 = vpop.f32.mrb[6].mxu1  ;;  %v2530_v24 = vld [vmem:[%s3279_s3 + $0x198] sm:$0xff]   ;;  %v2532_v30 = vld [vmem:[%s3279_s3 + $0x1e0] sm:$0xff]  }
  0xeb   :  { %1770 = vmatmul.mubr.bf16.vlgmr.msra.gmra.mrb[16].mxu0 %v690_v13  ;;  %v662_v32 = vmax.f32 %v435_v23, 0.0  ;;  %v439_v33 = vadd.f32 %v438_v28, %v84_v62  ;;  %v440_v34 = vpop.f32.mrb[7].mxu0  ;;  %1811 = vmatmul.mubr.bf16.vlgmr.msra.gmra.mrb[16].mxu1 %v692_v16  ;;  %v664_v44 = vmax.f32 %v478_v29, 0.0  ;;  %v482_v46 = vadd.f32 %v481_v36, %v92_v12  ;;  %v483_v48 = vpop.f32.mrb[7].mxu1 }
  0xec   :  { %2350 = vmatpush3.bf16.msra.mxu0 %v2517_v18  ;;  %v663_v43 = vmax.f32 %v437_v27, 0.0  ;;  %v441_v45 = vadd.f32 %v440_v34, %v88_v5  ;;  %2372 = vmatpush3.bf16.msra.mxu1 %v2518_v21  ;;  %v665_v53 = vmax.f32 %v480_v35, 0.0  ;;  %v484_v54 = vadd.f32 %v483_v48, %v96_v15  ;;  %v2527_v5 = vld [vmem:[%s3279_s3 + $0x158] sm:$0xff]  }
  0xed   :  { %2351 = vmatprep.subr.bf16.mxu0 %v2519_v22  ;;  %v678_v52 = vmax.f32 %v439_v33, 0.0  ;;  %2373 = vmatprep.subr.bf16.mxu1 %v2520_v26  ;;  %v680_v59 = vmax.f32 %v482_v46, 0.0  ;;  %v2529_v18 = vld [vmem:[%s3279_s3 + $0x118] sm:$0xff]   ;;  %v116_v29 = vrot.slane %v2929_v31, %v83_v47  ;;  %v120_v34 = vrot.slane %v2929_v31, %v87_v49 }
  0xee   :  { %v679_v58 = vmax.f32 %v441_v45, 0.0  ;;  %v681_v0 = vmax.f32 %v484_v54, 0.0  ;;  %v124_v35 = vrot.slane %v2929_v31, %v91_v57  ;;  %v128_v47 = vrot.slane %v2929_v31, %v95_v63  ;;  %v2534_v57 = vld [vmem:[%s3279_s3 + $0x1a0] sm:$0xff]  }
  0xef   :  { %v2952_v62 = vpack.c.bf16 %v678_v52, %v662_v32  ;;  %v2960_v4 = vpack.c.bf16 %v680_v59, %v664_v44 }
  0xf0   :  { %2352 = vmatpush3.bf16.msra.mxu0 %v2521_v39  ;;  %v695_v2 = vpack.c.bf16 %v679_v58, %v663_v43  ;;  %v520_v41 = vpop.f32.mrb[8].mxu0  ;;  %2374 = vmatpush3.bf16.msra.mxu1 %v2522_v50  ;;  %v697_v42 = vpack.c.bf16 %v681_v0, %v665_v53  ;;  %v563_v8 = vpop.f32.mrb[8].mxu1  ;;  %v2533_v43 = vld [vmem:[%s3279_s3 + $0x120] sm:$0xff]   ;;  %v2536_v50 = vld [vmem:[%s3279_s3 + $0x1e8] sm:$0xff]  }
  0xf1   :  { %2353 = vmatprep.subr.bf16.mxu0 %v2523_v51  ;;  %v521_v6 = vadd.f32 %v520_v41, %v100_v55  ;;  %v522_v7 = vpop.f32.mrb[9].mxu0  ;;  %2375 = vmatprep.subr.bf16.mxu1 %v2524_v56  ;;  %v564_v11 = vadd.f32 %v563_v8, %v108_v61  ;;  %v565_v12 = vpop.f32.mrb[9].mxu1  ;;  %v2540_v8 = vld [vmem:[%s3279_s3 + $0x1f0] sm:$0xff]  }
  0xf2   :  { %1851 = vmatprep.mubr.bf16.mxu0 %v695_v2  ;;  %v523_v9 = vadd.f32 %v522_v7, %v104_v60  ;;  %v524_v10 = vpop.f32.mrb[10].mxu0  ;;  %1892 = vmatprep.mubr.bf16.mxu1 %v697_v42  ;;  %v566_v16 = vadd.f32 %v565_v12, %v112_v38  ;;  %v567_v17 = vpop.f32.mrb[10].mxu1  ;;  %v2541_v12 = vld [vmem:[%s3279_s3 + $0x130] sm:$0xff]  }
  0xf3   :  { %v666_v13 = vmax.f32 %v521_v6, 0.0  ;;  %v525_v14 = vadd.f32 %v524_v10, %v100_v55  ;;  %v526_v15 = vpop.f32.mrb[11].mxu0  ;;  %v668_v20 = vmax.f32 %v564_v11, 0.0  ;;  %v568_v22 = vadd.f32 %v567_v17, %v108_v61  ;;  %v569_v23 = vpop.f32.mrb[11].mxu1  ;;  %v2537_v61 = vld [vmem:[%s3279_s3 + $0x128] sm:$0xff]  }
  0xf4   :  { %2354 = vmatpush3.bf16.msra.mxu0 %v2525_v1  ;;  %v667_v19 = vmax.f32 %v523_v9, 0.0  ;;  %v527_v21 = vadd.f32 %v526_v15, %v104_v60  ;;  %2376 = vmatpush3.bf16.msra.mxu1 %v2526_v40  ;;  %v669_v27 = vmax.f32 %v566_v16, 0.0  ;;  %v570_v28 = vadd.f32 %v569_v23, %v112_v38  ;;  %v2538_v40 = vld [vmem:[%s3279_s3 + $0x1a8] sm:$0xff]   ;;  %v2542_v15 = vld [vmem:[%s3279_s3 + $0x1b0] sm:$0xff]   ;;  %v2543_v16 = vld [vmem:[%s3279_s3 + $0x178] sm:$0xff]  }
  0xf5   :  { %2355 = vmatprep.subr.bf16.mxu0 %v2527_v5  ;;  %v682_v26 = vmax.f32 %v525_v14, 0.0  ;;  %2377 = vmatprep.subr.bf16.mxu1 %v2528_v3  ;;  %v684_v33 = vmax.f32 %v568_v22, 0.0  ;;  %v2539_v5 = vld [vmem:[%s3279_s3 + $0x170] sm:$0xff]   ;;  %v2548_v22 = vld [vmem:[%s3279_s3 + $0x2c0] sm:$0xff]  }
  0xf6   :  { %v683_v32 = vmax.f32 %v527_v21, 0.0  ;;  %v685_v39 = vmax.f32 %v570_v28, 0.0  ;;  %v2547_v21 = vld [vmem:[%s3279_s3 + $0x240] sm:$0xff]   ;;  %v2554_v28 = vld [vmem:[%s3279_s3 + $0x288] sm:$0xff]  }
  0xf7   :  { %v2992_v36 = vpack.c.bf16 %v682_v26, %v666_v13  ;;  %v3002_v45 = vpack.c.bf16 %v684_v33, %v668_v20  ;;  %v2546_v20 = vld [vmem:[%s3279_s3 + $0x1b8] sm:$0xff]   ;;  %v2549_v23 = vld [vmem:[%s3279_s3 + $0x200] sm:$0xff]   ;;  %v2552_v26 = vld [vmem:[%s3279_s3 + $0x2c8] sm:$0xff]  }
  0xf8   :  { %2356 = vmatpush3.bf16.msra.mxu0 %v2529_v18  ;;  %v3000_v44 = vpack.c.bf16 %v683_v32, %v667_v19  ;;  %v606_v49 = vpop.f32.mrb[12].mxu0  ;;  %2378 = vmatpush3.bf16.msra.mxu1 %v2530_v24  ;;  %v3010_v63 = vpack.c.bf16 %v685_v39, %v669_v27  ;;  %v649_v48 = vpop.f32.mrb[12].mxu1  ;;  %v2544_v18 = vld [vmem:[%s3279_s3 + $0x1f8] sm:$0xff]   ;;  %v2550_v24 = vld [vmem:[%s3279_s3 + $0x280] sm:$0xff]   ;;  %v2553_v27 = vld [vmem:[%s3279_s3 + $0x208] sm:$0xff]  }
  0xf9   :  { %2357 = vmatprep.subr.bf16.mxu0 %v2531_v25  ;;  %v607_v31 = vadd.f32 %v606_v49, %v116_v29  ;;  %v608_v46 = vpop.f32.mrb[13].mxu0  ;;  %2379 = vmatprep.subr.bf16.mxu1 %v2532_v30  ;;  %v650_v53 = vadd.f32 %v649_v48, %v124_v35  ;;  %v651_v54 = vpop.f32.mrb[13].mxu1  ;;  %v2545_v19 = vld [vmem:[%s3279_s3 + $0x138] sm:$0xff]   ;;  %v2551_v25 = vld [vmem:[%s3279_s3 + $0x248] sm:$0xff]   ;;  %v2558_v30 = vld [vmem:[%s3279_s3 + $0x290] sm:$0xff]  }
  0xfa   :  { %v609_v51 = vadd.f32 %v608_v46, %v120_v34  ;;  %v610_v52 = vpop.f32.mrb[14].mxu0  ;;  %v652_v59 = vadd.f32 %v651_v54, %v128_v47  ;;  %v653_v60 = vpop.f32.mrb[14].mxu1  ;;  %v2559_v32 = vld [vmem:[%s3279_s3 + $0x258] sm:$0xff]   ;;  %v2563_v39 = vld [vmem:[%s3279_s3 + $0x260] sm:$0xff]   ;;  %v2567_v49 = vld [vmem:[%s3279_s3 + $0x268] sm:$0xff]  }
  0xfb   :  { %v670_v55 = vmax.f32 %v607_v31, 0.0  ;;  %v611_v56 = vadd.f32 %v610_v52, %v116_v29  ;;  %v612_v58 = vpop.f32.mrb[15].mxu0  ;;  %v672_v38 = vmax.f32 %v650_v53, 0.0  ;;  %v654_v2 = vadd.f32 %v653_v60, %v124_v35  ;;  %v655_v41 = vpop.f32.mrb[15].mxu1  ;;  %v2555_v29 = vld [vmem:[%s3279_s3 + $0x250] sm:$0xff]   ;;  %v2560_v33 = vld [vmem:[%s3279_s3 + $0x2d8] sm:$0xff]  }
  0xfc   :  { %2358 = vmatpush3.bf16.msra.mxu0 %v2533_v43  ;;  %v671_v0 = vmax.f32 %v609_v51, 0.0  ;;  %v613_v1 = vadd.f32 %v612_v58, %v120_v34  ;;  %2380 = vmatpush3.bf16.msra.mxu1 %v2534_v57  ;;  %v673_v6 = vmax.f32 %v652_v59, 0.0  ;;  %v656_v7 = vadd.f32 %v655_v41, %v128_v47  ;;  %v2561_v34 = vld [vmem:[%s3279_s3 + $0x218] sm:$0xff]   ;;  %v2564_v47 = vld [vmem:[%s3279_s3 + $0x2e0] sm:$0xff]   ;;  %v2568_v57 = vld [vmem:[%s3279_s3 + $0x2e8] sm:$0xff]  }
  0xfd   :  { %2359 = vmatprep.subr.bf16.mxu0 %v2535_v37  ;;  %v686_v42 = vmax.f32 %v611_v56, 0.0  ;;  %2381 = vmatprep.subr.bf16.mxu1 %v2536_v50  ;;  %v688_v9 = vmax.f32 %v654_v2, 0.0  ;;  %v2562_v35 = vld [vmem:[%s3279_s3 + $0x298] sm:$0xff]   ;;  %v2565_v43 = vld [vmem:[%s3279_s3 + $0x220] sm:$0xff]   ;;  %v2569_v37 = vld [vmem:[%s3279_s3 + $0x228] sm:$0xff]  }
  0xfe   :  { %v687_v3 = vmax.f32 %v613_v1, 0.0  ;;  %v689_v11 = vmax.f32 %v656_v7, 0.0  ;;  %v2571_v31 = vld [vmem:[%s3279_s3 + $0x270] sm:$0xff]   ;;  %v2575_v51 = vld [vmem:[%s3279_s3 + $0x278] sm:$0xff]   ;;  %v2580_v56 = vld [vmem:[%s3279_s3 + $0x3c0] sm:$0xff]  }
  0xff   :  { %v3027_v10 = vpack.c.bf16 %v686_v42, %v670_v55  ;;  %v3034_v14 = vpack.c.bf16 %v688_v9, %v672_v38  ;;  %v2572_v46 = vld [vmem:[%s3279_s3 + $0x2f0] sm:$0xff]   ;;  %v2576_v52 = vld [vmem:[%s3279_s3 + $0x2f8] sm:$0xff]   ;;  %v2579_v55 = vld [vmem:[%s3279_s3 + $0x340] sm:$0xff]  }
 0x100   :  { %2360 = vmatpush3.bf16.msra.mxu0 %v2537_v61  ;;  %v3032_v13 = vpack.c.bf16 %v687_v3, %v671_v0  ;;  %2382 = vmatpush3.bf16.msra.mxu1 %v2538_v40  ;;  %v3042_v17 = vpack.c.bf16 %v689_v11, %v673_v6  ;;  %v2573_v48 = vld [vmem:[%s3279_s3 + $0x230] sm:$0xff]   ;;  %v2577_v53 = vld [vmem:[%s3279_s3 + $0x238] sm:$0xff]   ;;  %v2581_v58 = vld [vmem:[%s3279_s3 + $0x300] sm:$0xff]  }
 0x101   :  { %2361 = vmatprep.subr.bf16.mxu0 %v2539_v5  ;;  %2383 = vmatprep.subr.bf16.mxu1 %v2540_v8  ;;  %v2574_v50 = vld [vmem:[%s3279_s3 + $0x2b0] sm:$0xff]   ;;  %v2578_v54 = vld [vmem:[%s3279_s3 + $0x2b8] sm:$0xff]   ;;  %v2582_v59 = vld [vmem:[%s3279_s3 + $0x380] sm:$0xff]  }
 0x102   :  { %v2583_v60 = vld [vmem:[%s3279_s3 + $0x348] sm:$0xff]   ;;  %v2587_v1 = vld [vmem:[%s3279_s3 + $0x350] sm:$0xff]   ;;  %v2591_v41 = vld [vmem:[%s3279_s3 + $0x358] sm:$0xff]  }
 0x103   :  { %v2584_v61 = vld [vmem:[%s3279_s3 + $0x3c8] sm:$0xff]   ;;  %v2590_v2 = vld [vmem:[%s3279_s3 + $0x390] sm:$0xff]   ;;  %v2592_v40 = vld [vmem:[%s3279_s3 + $0x3d8] sm:$0xff]  }
 0x104   :  { %2362 = vmatpush3.bf16.msra.mxu0 %v2541_v12  ;;  %2384 = vmatpush3.bf16.msra.mxu1 %v2542_v15  ;;  %v2585_v0 = vld [vmem:[%s3279_s3 + $0x308] sm:$0xff]   ;;  %v2593_v5 = vld [vmem:[%s3279_s3 + $0x318] sm:$0xff]   ;;  %v2595_v6 = vld [vmem:[%s3279_s3 + $0x360] sm:$0xff]  }
 0x105   :  { %2363 = vmatprep.subr.bf16.mxu0 %v2543_v16  ;;  %2385 = vmatprep.subr.bf16.mxu1 %v2544_v18  ;;  %v2586_v38 = vld [vmem:[%s3279_s3 + $0x388] sm:$0xff]   ;;  %v2594_v42 = vld [vmem:[%s3279_s3 + $0x398] sm:$0xff]   ;;  %v2596_v7 = vld [vmem:[%s3279_s3 + $0x3e0] sm:$0xff]  }
 0x106   :  { %v2597_v8 = vld [vmem:[%s3279_s3 + $0x320] sm:$0xff]   ;;  %v2599_v9 = vld [vmem:[%s3279_s3 + $0x368] sm:$0xff]   ;;  %v2603_v15 = vld [vmem:[%s3279_s3 + $0x370] sm:$0xff]  }
 0x107   :  { %v2598_v3 = vld [vmem:[%s3279_s3 + $0x3a0] sm:$0xff]   ;;  %v2600_v11 = vld [vmem:[%s3279_s3 + $0x3e8] sm:$0xff]   ;;  %v2604_v16 = vld [vmem:[%s3279_s3 + $0x3f0] sm:$0xff]  }
 0x108   :  { %2364 = vmatpush3.bf16.msra.mxu0 %v2545_v19  ;;  %2386 = vmatpush3.bf16.msra.mxu1 %v2546_v20  ;;  %v2601_v12 = vld [vmem:[%s3279_s3 + $0x328] sm:$0xff]   ;;  %v2606_v18 = vld [vmem:[%s3279_s3 + $0x3b0] sm:$0xff]   ;;  %v2607_v19 = vld [vmem:[%s3279_s3 + $0x378] sm:$0xff]  }
 0x109   :  { %2393 = vmatprep.subr.bf16.mxu0 %v2547_v21  ;;  %2415 = vmatprep.subr.bf16.mxu1 %v2548_v22  ;;  %v2608_v20 = vld [vmem:[%s3279_s3 + $0x3f8] sm:$0xff]  }
 0x10a   :  { %v2609_v21 = vld [vmem:[%s3279_s3 + $0x338] sm:$0xff]  }
 0x10b   :  { %1852 = vmatmul.mubr.bf16.vlgmr.msra.gmra.mrb[20].mxu0 %v2952_v62  ;;  %1893 = vmatmul.mubr.bf16.vlgmr.msra.gmra.mrb[20].mxu1 %v2960_v4  ;;  %v2556_v62 = vld [vmem:[%s3279_s3 + $0x2d0] sm:$0xff]   ;;  %v2610_v22 = vld [vmem:[%s3279_s3 + $0x3b8] sm:$0xff]  }
 0x10c   :  { %2394 = vmatpush3.bf16.msra.mxu0 %v2549_v23  ;;  %2416 = vmatpush3.bf16.msra.mxu1 %v2550_v24  ;;  %v2557_v4 = vld [vmem:[%s3279_s3 + $0x210] sm:$0xff]  }
 0x10d   :  { %2395 = vmatprep.subr.bf16.mxu0 %v2551_v25  ;;  %2417 = vmatprep.subr.bf16.mxu1 %v2552_v26  ;;  %v2170_v25 = vld [vmem:[%s3281_s4] ss:$0 sm:$0xff] }
 0x10e   :  { %1933 = vmatprep.mubr.bf16.mxu0 %v3000_v44  ;;  %1974 = vmatprep.mubr.bf16.mxu1 %v3010_v63  ;;  %v2566_v44 = vld [vmem:[%s3279_s3 + $0x2a0] sm:$0xff]   ;;  %v2570_v63 = vld [vmem:[%s3279_s3 + $0x2a8] sm:$0xff]  }
 0x110   :  { %2396 = vmatpush3.bf16.msra.mxu0 %v2553_v27  ;;  %2418 = vmatpush3.bf16.msra.mxu1 %v2554_v28 }
 0x111   :  { %2397 = vmatprep.subr.bf16.mxu0 %v2555_v29  ;;  %2419 = vmatprep.subr.bf16.mxu1 %v2556_v62 }
 0x114   :  { %2398 = vmatpush3.bf16.msra.mxu0 %v2557_v4  ;;  %2420 = vmatpush3.bf16.msra.mxu1 %v2558_v30 }
 0x115   :  { %2399 = vmatprep.subr.bf16.mxu0 %v2559_v32  ;;  %2421 = vmatprep.subr.bf16.mxu1 %v2560_v33 }
 0x118   :  { %2400 = vmatpush3.bf16.msra.mxu0 %v2561_v34  ;;  %2422 = vmatpush3.bf16.msra.mxu1 %v2562_v35 }
 0x119   :  { %2401 = vmatprep.subr.bf16.mxu0 %v2563_v39  ;;  %2423 = vmatprep.subr.bf16.mxu1 %v2564_v47 }
 0x11c   :  { %2402 = vmatpush3.bf16.msra.mxu0 %v2565_v43  ;;  %2424 = vmatpush3.bf16.msra.mxu1 %v2566_v44 }
 0x11d   :  { %2403 = vmatprep.subr.bf16.mxu0 %v2567_v49  ;;  %2425 = vmatprep.subr.bf16.mxu1 %v2568_v57 }
 0x120   :  { %2404 = vmatpush3.bf16.msra.mxu0 %v2569_v37  ;;  %2426 = vmatpush3.bf16.msra.mxu1 %v2570_v63 }
 0x121   :  { %2405 = vmatprep.subr.bf16.mxu0 %v2571_v31  ;;  %2427 = vmatprep.subr.bf16.mxu1 %v2572_v46 }
 0x124   :  { %2406 = vmatpush3.bf16.msra.mxu0 %v2573_v48  ;;  %2428 = vmatpush3.bf16.msra.mxu1 %v2574_v50 }
 0x125   :  { %2407 = vmatprep.subr.bf16.mxu0 %v2575_v51  ;;  %2429 = vmatprep.subr.bf16.mxu1 %v2576_v52 }
 0x128   :  { %2408 = vmatpush3.bf16.msra.mxu0 %v2577_v53  ;;  %2430 = vmatpush3.bf16.msra.mxu1 %v2578_v54 }
 0x129   :  { %2437 = vmatprep.subr.bf16.mxu0 %v2579_v55  ;;  %2459 = vmatprep.subr.bf16.mxu1 %v2580_v56 }
 0x12b   :  { %1934 = vmatmul.mubr.bf16.vlgmr.msra.gmra.mrb[24].mxu0 %v2992_v36  ;;  %1975 = vmatmul.mubr.bf16.vlgmr.msra.gmra.mrb[24].mxu1 %v3002_v45  ;;  %v2588_v36 = vld [vmem:[%s3279_s3 + $0x3d0] sm:$0xff]  }
 0x12c   :  { %2438 = vmatpush3.bf16.msra.mxu0 %v2581_v58  ;;  %2460 = vmatpush3.bf16.msra.mxu1 %v2582_v59  ;;  %v2589_v45 = vld [vmem:[%s3279_s3 + $0x310] sm:$0xff]  }
 0x12d   :  { %2439 = vmatprep.subr.bf16.mxu0 %v2583_v60  ;;  %2461 = vmatprep.subr.bf16.mxu1 %v2584_v61 }
 0x12e   :  { %2015 = vmatprep.mubr.bf16.mxu0 %v3032_v13  ;;  %2056 = vmatprep.mubr.bf16.mxu1 %v3042_v17  ;;  %v2602_v13 = vld [vmem:[%s3279_s3 + $0x3a8] sm:$0xff]   ;;  %v2605_v17 = vld [vmem:[%s3279_s3 + $0x330] sm:$0xff]  }
 0x130   :  { %2440 = vmatpush3.bf16.msra.mxu0 %v2585_v0  ;;  %2462 = vmatpush3.bf16.msra.mxu1 %v2586_v38 }
 0x131   :  { %2441 = vmatprep.subr.bf16.mxu0 %v2587_v1  ;;  %2463 = vmatprep.subr.bf16.mxu1 %v2588_v36 }
 0x134   :  { %2442 = vmatpush3.bf16.msra.mxu0 %v2589_v45  ;;  %2464 = vmatpush3.bf16.msra.mxu1 %v2590_v2 }
 0x135   :  { %2443 = vmatprep.subr.bf16.mxu0 %v2591_v41  ;;  %2465 = vmatprep.subr.bf16.mxu1 %v2592_v40 }
 0x138   :  { %2444 = vmatpush3.bf16.msra.mxu0 %v2593_v5  ;;  %2466 = vmatpush3.bf16.msra.mxu1 %v2594_v42 }
 0x139   :  { %2445 = vmatprep.subr.bf16.mxu0 %v2595_v6  ;;  %2467 = vmatprep.subr.bf16.mxu1 %v2596_v7 }
 0x13c   :  { %2446 = vmatpush3.bf16.msra.mxu0 %v2597_v8  ;;  %2468 = vmatpush3.bf16.msra.mxu1 %v2598_v3 }
 0x13d   :  { %2447 = vmatprep.subr.bf16.mxu0 %v2599_v9  ;;  %2469 = vmatprep.subr.bf16.mxu1 %v2600_v11 }
 0x140   :  { %2448 = vmatpush3.bf16.msra.mxu0 %v2601_v12  ;;  %2470 = vmatpush3.bf16.msra.mxu1 %v2602_v13 }
 0x141   :  { %2449 = vmatprep.subr.bf16.mxu0 %v2603_v15  ;;  %2471 = vmatprep.subr.bf16.mxu1 %v2604_v16 }
 0x144   :  { %2450 = vmatpush3.bf16.msra.mxu0 %v2605_v17  ;;  %2472 = vmatpush3.bf16.msra.mxu1 %v2606_v18 }
 0x145   :  { %2451 = vmatprep.subr.bf16.mxu0 %v2607_v19  ;;  %2473 = vmatprep.subr.bf16.mxu1 %v2608_v20  ;;  %v2616_v20 = vld [vmem:[%s3278_s0] sm:$0xff]  }
 0x148   :  { %2452 = vmatpush3.bf16.msra.mxu0 %v2609_v21  ;;  %2474 = vmatpush3.bf16.msra.mxu1 %v2610_v22  ;;  %v2065_v21 = vunpack.c.l.bf16 %v2616_v20 }
 0x14b   :  { %2016 = vmatmul.mubr.bf16.vlgmr.msra.gmra.mrb[28].mxu0 %v3027_v10  ;;  %2057 = vmatmul.mubr.bf16.vlgmr.msra.gmra.mrb[28].mxu1 %v3034_v14 }
 0x1be   :  { %v2321_v23 = vpop.f32.mrb[16].mxu0  ;;  %v2343_v24 = vpop.f32.mrb[16].mxu1 }
 0x1bf   :  { %v2322_v26 = vpop.f32.mrb[17].mxu0  ;;  %v2344_v28 = vpop.f32.mrb[17].mxu1 }
 0x1c0   :  { %v2323_v27 = vadd.f32 %v2322_v26, %v2321_v23  ;;  %v2324_v29 = vpop.f32.mrb[18].mxu0  ;;  %v2345_v62 = vadd.f32 %v2344_v28, %v2343_v24  ;;  %v2346_v4 = vpop.f32.mrb[18].mxu1 }
 0x1c1   :  { %v2325_v30 = vpop.f32.mrb[19].mxu0  ;;  %v2347_v34 = vpop.f32.mrb[19].mxu1 }
 0x1c2   :  { %v1772_v32 = vadd.f32 %v2323_v27, %v2170_v25  ;;  %v2326_v33 = vadd.f32 %v2325_v30, %v2324_v29  ;;  %v2348_v35 = vadd.f32 %v2347_v34, %v2346_v4 }
 0x1c4   :  { %v1813_v10 = vadd.f32 %v2345_v62, %v1772_v32  ;;  %v1775_v39 = vadd.f32 %v2326_v33, %v2170_v25  ;;  %v2066_v25 = vunpack.c.h.bf16 %v2616_v20 }
 0x1c6   :  { %v1816_v14 = vadd.f32 %v2348_v35, %v1775_v39 }
 0x1de   :  { %v2365_v47 = vpop.f32.mrb[20].mxu0  ;;  %v2387_v43 = vpop.f32.mrb[20].mxu1 }
 0x1df   :  { %v2366_v44 = vpop.f32.mrb[21].mxu0  ;;  %v2388_v57 = vpop.f32.mrb[21].mxu1 }
 0x1e0   :  { %v2367_v49 = vadd.f32 %v2366_v44, %v2365_v47  ;;  %v2368_v37 = vpop.f32.mrb[22].mxu0  ;;  %v2389_v63 = vadd.f32 %v2388_v57, %v2387_v43  ;;  %v2390_v31 = vpop.f32.mrb[22].mxu1 }
 0x1e1   :  { %v2369_v46 = vpop.f32.mrb[23].mxu0  ;;  %v2391_v51 = vpop.f32.mrb[23].mxu1 }
 0x1e2   :  { %v1854_v48 = vadd.f32 %v2367_v49, %v1813_v10  ;;  %v2370_v50 = vadd.f32 %v2369_v46, %v2368_v37  ;;  %v2392_v52 = vadd.f32 %v2391_v51, %v2390_v31  ;;  %v2299_v46 = vld [vmem:[%s3282_s5] ss:$0 sm:$0xff] }
 0x1e4   :  { %v1895_v53 = vadd.f32 %v2389_v63, %v1854_v48  ;;  %v1857_v54 = vadd.f32 %v2370_v50, %v1816_v14  ;;  %v2300_v50 = vld [vmem:[%s3283_s6] ss:$0 sm:$0xff] }
 0x1e6   :  { %v1898_v55 = vadd.f32 %v2392_v52, %v1857_v54 }
 0x1fe   :  { %v2409_v56 = vpop.f32.mrb[24].mxu0  ;;  %v2431_v58 = vpop.f32.mrb[24].mxu1 }
 0x1ff   :  { %v2410_v59 = vpop.f32.mrb[25].mxu0  ;;  %v2432_v61 = vpop.f32.mrb[25].mxu1 }
 0x200   :  { %v2411_v60 = vadd.f32 %v2410_v59, %v2409_v56  ;;  %v2412_v0 = vpop.f32.mrb[26].mxu0  ;;  %v2433_v38 = vadd.f32 %v2432_v61, %v2431_v58  ;;  %v2434_v1 = vpop.f32.mrb[26].mxu1 }
 0x201   :  { %v2413_v36 = vpop.f32.mrb[27].mxu0  ;;  %v2435_v41 = vpop.f32.mrb[27].mxu1 }
 0x202   :  { %v1936_v45 = vadd.f32 %v2411_v60, %v1895_v53  ;;  %v2414_v2 = vadd.f32 %v2413_v36, %v2412_v0  ;;  %v2436_v40 = vadd.f32 %v2435_v41, %v2434_v1 }
 0x204   :  { %v1977_v5 = vadd.f32 %v2433_v38, %v1936_v45  ;;  %v1939_v42 = vadd.f32 %v2414_v2, %v1898_v55 }
 0x206   :  { %v1980_v6 = vadd.f32 %v2436_v40, %v1939_v42 }
 0x21e   :  { %v2453_v7 = vpop.f32.mrb[28].mxu0  ;;  %v2475_v8 = vpop.f32.mrb[28].mxu1 }
 0x21f   :  { %v2454_v3 = vpop.f32.mrb[29].mxu0  ;;  %v2476_v11 = vpop.f32.mrb[29].mxu1 }
 0x220   :  { %v2455_v9 = vadd.f32 %v2454_v3, %v2453_v7  ;;  %v2456_v12 = vpop.f32.mrb[30].mxu0  ;;  %v2477_v13 = vadd.f32 %v2476_v11, %v2475_v8  ;;  %v2478_v15 = vpop.f32.mrb[30].mxu1 }
 0x221   :  { %v2457_v16 = vpop.f32.mrb[31].mxu0  ;;  %v2479_v19 = vpop.f32.mrb[31].mxu1 }
 0x222   :  { %v2018_v17 = vadd.f32 %v2455_v9, %v1977_v5  ;;  %v2458_v18 = vadd.f32 %v2457_v16, %v2456_v12  ;;  %v2480_v22 = vadd.f32 %v2479_v19, %v2478_v15 }
 0x224   :  { %v2059_v23 = vadd.f32 %v2477_v13, %v2018_v17  ;;  %v2021_v24 = vadd.f32 %v2458_v18, %v1980_v6 }
 0x226   :  { %v2062_v26 = vadd.f32 %v2480_v22, %v2021_v24  ;;  %v2067_v27 = vadd.f32 %v2065_v21, %v2059_v23 }
 0x228   :  { %v2069_v28 = vsel %vm310_vm0, %v2067_v27, 0.0  ;;  %v2068_v29 = vadd.f32 %v2066_v25, %v2062_v26 }
 0x229   :  { %2070 = vadd.xlane.f32.xlu0 %v2069_v28 }
 0x22a   :  { %v2072_v62 = vsel %vm310_vm0, %v2068_v29, 0.0 }
 0x22d   :  { %2073 = vadd.xlane.f32.xlu0 %v2072_v62 }
 0x2b6   :  { %v2071_v4 = vpop.xlane.xlu0 %2070 }
 0x2b7   :  { %v2076_v30 = vmul.f32 0.03125, %v2071_v4 }
 0x2b9   :  { %v2078_v32 = vsub.f32 %v2067_v27, %v2076_v30 }
 0x2ba   :  { %v2074_v33 = vpop.xlane.xlu0 %2073 }
 0x2bb   :  { %v2077_v34 = vmul.f32 0.03125, %v2074_v33  ;;  %v2080_v35 = vmul.f32 %v2078_v32, %v2078_v32 }
 0x2bd   :  { %v2079_v10 = vsub.f32 %v2068_v29, %v2077_v34  ;;  %v2082_v39 = vsel %vm310_vm0, %v2080_v35, 0.0 }
 0x2be   :  { %2083 = vadd.xlane.f32.xlu1 %v2082_v39 }
 0x2bf   :  { %v2081_v14 = vmul.f32 %v2079_v10, %v2079_v10 }
 0x2c1   :  { %v2085_v47 = vsel %vm310_vm0, %v2081_v14, 0.0 }
 0x2c2   :  { %2086 = vadd.xlane.f32.xlu1 %v2085_v47 }
 0x34b   :  { %v2084_v43 = vpop.xlane.xlu1 %2083 }
 0x34c   :  { %v2088_v44 = vmul.f32 0.03125, %v2084_v43 }
 0x34e   :  { %v2090_v49 = vadd.f32 1e-05, %v2088_v44 }
 0x34f   :  { %v2087_v57 = vpop.xlane.xlu1 %2086 }
 0x350   :  { %2612 = vrsqrt.f32 %v2090_v49  ;;  %v2089_v37 = vmul.f32 0.03125, %v2087_v57 }
 0x352   :  { %v2091_v63 = vadd.f32 1e-05, %v2089_v37 }
 0x354   :  { %2614 = vrsqrt.f32 %v2091_v63 }
 0x35a   :  { %v2613_v31 = vpop.eup %2612 }
 0x35b   :  { %v2094_v48 = vmul.f32 %v2613_v31, %v2078_v32 }
 0x35d   :  { %v2103_v51 = vmul.f32 %v2299_v46, %v2094_v48 }
 0x35e   :  { %v2615_v52 = vpop.eup %2614 }
 0x35f   :  { %v2112_v53 = vadd.f32 %v2300_v50, %v2103_v51  ;;  %v2095_v54 = vmul.f32 %v2615_v52, %v2079_v10 }
 0x361   :  { %v2303_v55 = vpack.c.bf16 %v2112_v53, %v2112_v53  ;;  %v2104_v56 = vmul.f32 %v2299_v46, %v2095_v54 }
 0x363   :  { %2123 = vst.msk [vmem:[%s3284_s7] sm:$0xf] %vm2122_vm1, %v2303_v55  ;;  %v2113_v58 = vadd.f32 %v2300_v50, %v2104_v56 }
 0x365   :  { %v2304_v59 = vpack.c.bf16 %v2113_v58, %v2113_v58 }
 0x367   :  { %2124 = vst.msk [vmem:[%s3284_s7 + $0x4] sm:$0xf] %vm2122_vm1, %v2304_v59 }

</bundles_post_ra>
